<compile_context>
chip_gen: v5e
topology: v5e:2x2
jax: 0.10.0
libtpu: 0.0.40
codegen_flags: <defaults>
</compile_context>

<pallas_src>
import jax
import jax.numpy as jnp
from jax.experimental import pallas as pl
from jax.experimental.pallas import tpu as pltpu

IGNORE_INDEX = -1

# ---- model / problem sizes (small, consistent with the module's forward) ----
BATCH = 2
SEQ = 8          # token sequence length
HIDDEN = 32
VOCAB = 512      # multiple of 128 -> vocab sits on the lane axis

# Demo tile sizes (kept small so the toy problem still exercises a multi-tile
# grid).  Production: tile_m = 128 (v5e) / 256 (v6e, v7x), tile_v = 1024 (v7x,
# 64 MiB VMEM) / 2048-4096 (v5e/v6e, 128 MiB VMEM).
DEMO_TILE_M = 128
DEMO_TILE_V = 128


def _pick_vmem_limit():
    """~75% of physical VMEM (≈48 MiB on v7x, ≈96 MiB on v5e/v6e), capped at 100 MiB."""
    cap = 64 * 1024 * 1024  # conservative fallback (safe on every chip)
    try:
        info = pltpu.get_tpu_info()
        cap = int(getattr(info, "vmem_capacity_bytes", cap) or cap)
    except Exception:
        pass
    return int(min(cap * 3 // 4, 100 * 1024 * 1024))


def _ce_kernel(x_ref, w_ref, b_ref, labels_ref, out_ref, m_scr, l_scr, pick_scr):
    """Fused output projection + masked cross-entropy with vocab-streamed online LSE.

    Grid: (row tiles [parallel], vocab tiles [arbitrary, innermost]).

    x_ref:      (TM, H)     f32   hidden states (cast to bf16 in-kernel)
    w_ref:      (H, TV)     bf16  one vocab slab of the output projection weight
    b_ref:      (1, TV)     f32   matching bias slab
    labels_ref: (TM, 1)     i32   shifted labels, IGNORE_INDEX where masked/padded
    out_ref:    (1, 1, 128) f32   lane 0: partial NLL sum, lane 1: partial valid count
    m_scr/l_scr/pick_scr: (TM, 1) f32 running max / sum-exp / picked target logit
    """
    v_idx = pl.program_id(1)
    tile_v = w_ref.shape[1]

    @pl.when(v_idx == 0)
    def _init():
        m_scr[...] = jnp.full_like(m_scr, -1e30)
        l_scr[...] = jnp.zeros_like(l_scr)
        pick_scr[...] = jnp.zeros_like(pick_scr)

    # MXU: bf16 x bf16 -> f32 accumulator; bias add stays f32.
    x = x_ref[...].astype(jnp.bfloat16)                                      # (TM, H)
    logits = jnp.dot(x, w_ref[...],
                     preferred_element_type=jnp.float32) + b_ref[...]        # (TM, TV)

    # Online logsumexp update (all f32; exp/log on the EUP, reductions on the XLU).
    tile_max = jnp.max(logits, axis=-1, keepdims=True)                       # (TM, 1)
    m_new = jnp.maximum(m_scr[...], tile_max)                                # (TM, 1)
    alpha = jnp.exp(m_scr[...] - m_new)                                      # (TM, 1)
    shifted = logits - m_new                                                 # (TM, TV)
    p = jnp.exp(shifted)                                                     # (TM, TV)
    l_scr[...] = alpha * l_scr[...] + jnp.sum(p, axis=-1, keepdims=True)

    # Fused target-logit pick, re-using `shifted` (one less full pass over logits).
    # Compare against tile-local column ids: labels - v*TILE_V.  IGNORE_INDEX (-1)
    # never lands in any tile, so masked/padded rows accumulate 0.
    lab = labels_ref[...]                                                    # (TM, 1)
    lab_local = lab - v_idx * tile_v                                         # (TM, 1)
    local_iota = jax.lax.broadcasted_iota(jnp.int32, logits.shape, 1)        # (TM, TV)
    onehot = local_iota == lab_local                                         # (TM, TV)
    in_tile = (lab_local >= 0) & (lab_local < tile_v)                        # (TM, 1)
    pick_scr[...] = (pick_scr[...]
                     + jnp.sum(jnp.where(onehot, shifted, 0.0), axis=-1, keepdims=True)
                     + jnp.where(in_tile, m_new, 0.0))
    m_scr[...] = m_new

    @pl.when(v_idx == pl.num_programs(1) - 1)
    def _finalize():
        lse = m_scr[...] + jnp.log(l_scr[...])                               # (TM, 1)
        labf = labels_ref[...]                                               # (TM, 1)
        valid = labf != IGNORE_INDEX                                         # (TM, 1)
        nll = jnp.where(valid, lse - pick_scr[...], 0.0)                     # (TM, 1)

        loss_sum = jnp.sum(nll)
        count = jnp.sum(valid.astype(jnp.float32))

        # Lane-dense partial row (written once per ROW TILE, not per grid step):
        # lane 0 = loss sum, lane 1 = valid count.
        lane = jax.lax.broadcasted_iota(jnp.int32, out_ref.shape, 2)
        out_ref[...] = (jnp.where(lane == 0, loss_sum, 0.0)
                        + jnp.where(lane == 1, count, 0.0))


def masked_cross_entropy_pallas(hidden, w, b, labels, *,
                                tile_m=256, tile_v=1024):
    """hidden: (N, H) f32, w: (H, V) f32, b: (V,) f32, labels: (N,) int32."""
    n, h = hidden.shape
    v = w.shape[1]

    tile_v = min(tile_v, v)
    assert tile_v % 128 == 0 and v % tile_v == 0, (
        "vocab must be a multiple of tile_v (pad W columns with bias=-1e30 otherwise)")
    num_v_tiles = v // tile_v

    # Row tiles: force an even count (>= 2) so both v7x TensorCores get work
    # (no-op cost on the single-TC v5e/v6e).
    num_row_tiles = pl.cdiv(n, tile_m)
    if num_row_tiles % 2:
        num_row_tiles += 1
    n_pad = num_row_tiles * tile_m
    pad_rows = n_pad - n

    # No host-side bf16 cast of the activations (cast happens in-kernel); only the
    # row pad remains so every block stays in-bounds.  Padded rows carry
    # IGNORE_INDEX labels and contribute nothing to loss or count.
    # TODO(synk): at real N, replace this pad with an in-kernel row mask built from
    #             a broadcasted_iota against the static row count.
    x = jnp.pad(hidden, ((0, pad_rows), (0, 0)))
    lab = jnp.pad(labels.astype(jnp.int32), (0, pad_rows),
                  constant_values=IGNORE_INDEX).reshape(n_pad, 1)
    # TODO(synk): labels could be made lane-dense ((num_tiles, TM) blocks) or
    #             scalar-prefetched into SMEM; with the vocab axis innermost the
    #             (TM,1) column is DMA'd only once per row tile, so it is cheap.

    # Weight/bias are model parameters (one-time prep; a real model stores them bf16).
    # TODO(synk): on v7x, store W in fp8 to halve the dominant HBM stream.
    w_bf = w.astype(jnp.bfloat16)
    b2 = b.reshape(1, v).astype(jnp.float32)

    # Grid layout: row tiles outer ("parallel"), vocab tiles inner ("arbitrary").
    # x / labels / output block indices are constant along the inner axis -> fetched
    # and written back once per row tile.  W/bias stream over the inner axis.
    # TODO(synk): for very large V and N, W is re-read once per row tile here;
    #             a two-level (emit_pipeline) blocking or row-innermost ordering
    #             would read W from HBM exactly once at the cost of per-row-tile
    #             accumulator state.
    partial = pl.pallas_call(
        _ce_kernel,
        out_shape=jax.ShapeDtypeStruct((num_row_tiles, 1, 128), jnp.float32),
        grid=(num_row_tiles, num_v_tiles),
        in_specs=[
            pl.BlockSpec((tile_m, h), lambda i, j: (i, 0)),    # x: once per row tile
            pl.BlockSpec((h, tile_v), lambda i, j: (0, j)),    # W: streamed over vocab
            pl.BlockSpec((1, tile_v), lambda i, j: (0, j)),    # bias: streamed over vocab
            pl.BlockSpec((tile_m, 1), lambda i, j: (i, 0)),    # labels: once per row tile
        ],
        out_specs=pl.BlockSpec((1, 1, 128), lambda i, j: (i, 0, 0)),
        scratch_shapes=[
            pltpu.VMEM((tile_m, 1), jnp.float32),   # running max
            pltpu.VMEM((tile_m, 1), jnp.float32),   # running sum-exp
            pltpu.VMEM((tile_m, 1), jnp.float32),   # running picked target logit
        ],
        compiler_params=pltpu.CompilerParams(
            dimension_semantics=("parallel", "arbitrary"),
            vmem_limit_bytes=_pick_vmem_limit(),
        ),
    )(x, w_bf, b2, lab)

    loss_sum = jnp.sum(partial[:, 0, 0])
    count = jnp.sum(partial[:, 0, 1])
    # Divergence from F.cross_entropy: an all-ignored batch returns 0, not NaN.
    return loss_sum / jnp.maximum(count, 1.0)


def sft_cross_entropy_loss(seq, prompt_len, embed, w_out, b_out, *,
                           tile_m=DEMO_TILE_M, tile_v=DEMO_TILE_V):
    """Mirrors SFTTrainer.get_cross_entropy_loss with prompt_len_or_mask = lengths."""
    b, s = seq.shape
    # prompt mask: positions < prompt_len are prompt (loss-ignored on labels)
    prompt_mask = jnp.arange(s)[None, :] < prompt_len[:, None]          # (B, S) bool
    inputs, labels = seq[:, :-1], seq[:, 1:]                            # (B, S-1)
    labels = jnp.where(prompt_mask[:, 1:], IGNORE_INDEX, labels)        # masked_fill_

    # tiny synthetic LM: hidden = embedding lookup (glue), projection + CE in kernel
    hidden = jnp.take(embed, inputs, axis=0)                            # (B, S-1, H)
    n = b * (s - 1)
    hidden = hidden.reshape(n, embed.shape[1])
    labels_flat = labels.reshape(n)

    return masked_cross_entropy_pallas(hidden, w_out, b_out, labels_flat,
                                       tile_m=tile_m, tile_v=tile_v)


def _reference_loss(seq, prompt_len, embed, w_out, b_out):
    """Pure-JAX f32 reference for correctness check."""
    b, s = seq.shape
    prompt_mask = jnp.arange(s)[None, :] < prompt_len[:, None]
    inputs, labels = seq[:, :-1], seq[:, 1:]
    labels = jnp.where(prompt_mask[:, 1:], IGNORE_INDEX, labels)
    hidden = jnp.take(embed, inputs, axis=0)
    logits = hidden @ w_out + b_out                                     # (B, S-1, V)
    logp = jax.nn.log_softmax(logits, axis=-1)
    safe_labels = jnp.where(labels == IGNORE_INDEX, 0, labels)
    picked = jnp.take_along_axis(logp, safe_labels[..., None], axis=-1)[..., 0]
    valid = labels != IGNORE_INDEX
    return jnp.sum(jnp.where(valid, -picked, 0.0)) / jnp.sum(valid)


if __name__ == "__main__":
    key = jax.random.PRNGKey(0)
    k_seq, k_emb, k_w = jax.random.split(key, 3)

    # deterministic synthetic inputs / parameters
    seq = jax.random.randint(k_seq, (BATCH, SEQ), 0, VOCAB, dtype=jnp.int32)
    prompt_len = jnp.array([3, 5], dtype=jnp.int32)                     # torch.long path
    embed = (0.02 * jax.random.normal(k_emb, (VOCAB, HIDDEN))).astype(jnp.float32)
    w_out = (0.02 * jax.random.normal(k_w, (HIDDEN, VOCAB))).astype(jnp.float32)
    b_out = jnp.zeros((VOCAB,), dtype=jnp.float32)

    loss = sft_cross_entropy_loss(seq, prompt_len, embed, w_out, b_out)
    loss = jax.block_until_ready(loss)

    ref = jax.block_until_ready(_reference_loss(seq, prompt_len, embed, w_out, b_out))
    # bf16 MXU operands vs f32 reference -> slightly relaxed tolerance
    assert jnp.allclose(loss, ref, rtol=5e-3, atol=5e-3), (loss, ref)

    print("KERNEL_OK")
</pallas_src>

<mosaic_0001>
module attributes {stable_mosaic.version = 11 : i64} {
  func.func @_ce_kernel(%arg0: i32, %arg1: i32, %arg2: memref<128x32xf32, #tpu.memory_space<vmem>>, %arg3: memref<32x128xbf16, #tpu.memory_space<vmem>>, %arg4: memref<1x128xf32, #tpu.memory_space<vmem>>, %arg5: memref<128x1xi32, #tpu.memory_space<vmem>>, %arg6: memref<1x1x128xf32, #tpu.memory_space<vmem>>, %arg7: memref<128x1xf32, #tpu.memory_space<vmem>>, %arg8: memref<128x1xf32, #tpu.memory_space<vmem>>, %arg9: memref<128x1xf32, #tpu.memory_space<vmem>>) attributes {dimension_semantics = [#tpu.dimension_semantics<parallel>, #tpu.dimension_semantics<arbitrary>], iteration_bounds = array<i64: 2, 4>, scalar_prefetch = 0 : i64, scratch_operands = 3 : i64, tpu.core_type = #tpu.core_type<tc>, window_params = [{transform_indices = @transform_0, window_bounds = array<i64: 128, 32>}, {transform_indices = @transform_1, window_bounds = array<i64: 32, 128>}, {transform_indices = @transform_2, window_bounds = array<i64: 1, 128>}, {transform_indices = @transform_3, window_bounds = array<i64: 128, 1>}, {transform_indices = @transform_4, window_bounds = array<i64: 1, 1, 128>}]} {
    %c0_i32 = arith.constant 0 : i32
    %0 = arith.cmpi eq, %arg1, %c0_i32 : i32
    %1 = arith.extui %0 : i1 to i32
    %c0_i32_0 = arith.constant 0 : i32
    %2 = arith.cmpi ne, %1, %c0_i32_0 : i32
    scf.if %2 {
      %cst_30 = arith.constant -1.000000e+30 : f32
      %52 = vector.broadcast %cst_30 : f32 to vector<128x1xf32>
      %c0_31 = arith.constant 0 : index
      %c0_32 = arith.constant 0 : index
      %53 = vector.load %arg7[%c0_31, %c0_32] : memref<128x1xf32, #tpu.memory_space<vmem>>, vector<128x1xf32>
      tpu.vector_store %arg7[%c0_31, %c0_32], %52 {strides = array<i32>} : memref<128x1xf32, #tpu.memory_space<vmem>>, vector<128x1xf32>,
      %cst_33 = arith.constant 0.000000e+00 : f32
      %54 = vector.broadcast %cst_33 : f32 to vector<128x1xf32>
      %c0_34 = arith.constant 0 : index
      %c0_35 = arith.constant 0 : index
      %55 = vector.load %arg8[%c0_34, %c0_35] : memref<128x1xf32, #tpu.memory_space<vmem>>, vector<128x1xf32>
      tpu.vector_store %arg8[%c0_34, %c0_35], %54 {strides = array<i32>} : memref<128x1xf32, #tpu.memory_space<vmem>>, vector<128x1xf32>,
      %cst_36 = arith.constant 0.000000e+00 : f32
      %56 = vector.broadcast %cst_36 : f32 to vector<128x1xf32>
      %c0_37 = arith.constant 0 : index
      %c0_38 = arith.constant 0 : index
      %57 = vector.load %arg9[%c0_37, %c0_38] : memref<128x1xf32, #tpu.memory_space<vmem>>, vector<128x1xf32>
      tpu.vector_store %arg9[%c0_37, %c0_38], %56 {strides = array<i32>} : memref<128x1xf32, #tpu.memory_space<vmem>>, vector<128x1xf32>,
    } else {
    }
    %c0 = arith.constant 0 : index
    %c0_1 = arith.constant 0 : index
    %3 = vector.load %arg2[%c0, %c0_1] : memref<128x32xf32, #tpu.memory_space<vmem>>, vector<128x32xf32>
    %4 = arith.truncf %3 : vector<128x32xf32> to vector<128x32xbf16>
    %c0_2 = arith.constant 0 : index
    %c0_3 = arith.constant 0 : index
    %5 = vector.load %arg3[%c0_2, %c0_3] : memref<32x128xbf16, #tpu.memory_space<vmem>>, vector<32x128xbf16>
    %cst = arith.constant dense<0.000000e+00> : vector<128x128xf32>
    %6 = tpu.matmul %4, %5, %cst {dimension_numbers = #tpu.dot_dimension_numbers<[1], [0], [0], [1], [0, 0, 1, 1], [], []>} : vector<128x32xbf16>, vector<32x128xbf16>, vector<128x128xf32> -> vector<128x128xf32>
    %c0_4 = arith.constant 0 : index
    %c0_5 = arith.constant 0 : index
    %7 = vector.load %arg4[%c0_4, %c0_5] : memref<1x128xf32, #tpu.memory_space<vmem>>, vector<1x128xf32>
    %8 = vector.broadcast %7 : vector<1x128xf32> to vector<128x128xf32>
    %9 = arith.addf %6, %8 : vector<128x128xf32>
    %cst_6 = arith.constant dense<0xFF800000> : vector<128xf32>
    %10 = vector.multi_reduction <maximumf>, %9, %cst_6 [1] : vector<128x128xf32> to vector<128xf32>
    %11 = vector.shape_cast %10 : vector<128xf32> to vector<128x1xf32>
    %c0_7 = arith.constant 0 : index
    %c0_8 = arith.constant 0 : index
    %12 = vector.load %arg7[%c0_7, %c0_8] : memref<128x1xf32, #tpu.memory_space<vmem>>, vector<128x1xf32>
    %13 = arith.maximumf %12, %11 : vector<128x1xf32>
    %c0_9 = arith.constant 0 : index
    %c0_10 = arith.constant 0 : index
    %14 = vector.load %arg7[%c0_9, %c0_10] : memref<128x1xf32, #tpu.memory_space<vmem>>, vector<128x1xf32>
    %15 = arith.subf %14, %13 : vector<128x1xf32>
    %16 = math.exp %15 : vector<128x1xf32>
    %17 = vector.broadcast %13 : vector<128x1xf32> to vector<128x128xf32>
    %18 = arith.subf %9, %17 : vector<128x128xf32>
    %19 = math.exp %18 : vector<128x128xf32>
    %c0_11 = arith.constant 0 : index
    %c0_12 = arith.constant 0 : index
    %20 = vector.load %arg8[%c0_11, %c0_12] : memref<128x1xf32, #tpu.memory_space<vmem>>, vector<128x1xf32>
    %21 = arith.mulf %16, %20 : vector<128x1xf32>
    %cst_13 = arith.constant dense<0.000000e+00> : vector<128xf32>
    %22 = vector.multi_reduction <add>, %19, %cst_13 [1] : vector<128x128xf32> to vector<128xf32>
    %23 = vector.shape_cast %22 : vector<128xf32> to vector<128x1xf32>
    %24 = arith.addf %21, %23 : vector<128x1xf32>
    %c0_14 = arith.constant 0 : index
    %c0_15 = arith.constant 0 : index
    %25 = vector.load %arg8[%c0_14, %c0_15] : memref<128x1xf32, #tpu.memory_space<vmem>>, vector<128x1xf32>
    tpu.vector_store %arg8[%c0_14, %c0_15], %24 {strides = array<i32>} : memref<128x1xf32, #tpu.memory_space<vmem>>, vector<128x1xf32>,
    %c0_16 = arith.constant 0 : index
    %c0_17 = arith.constant 0 : index
    %26 = vector.load %arg5[%c0_16, %c0_17] : memref<128x1xi32, #tpu.memory_space<vmem>>, vector<128x1xi32>
    %c128_i32 = arith.constant 128 : i32
    %27 = arith.muli %arg1, %c128_i32 : i32
    %28 = vector.broadcast %27 : i32 to vector<128x1xi32>
    %29 = arith.subi %26, %28 : vector<128x1xi32>
    %30 = tpu.iota {dimensions = array<i32: 1>} : vector<128x128xi32>
    %31 = vector.broadcast %29 : vector<128x1xi32> to vector<128x128xi32>
    %32 = arith.cmpi eq, %30, %31 : vector<128x128xi32>
    %c0_i32_18 = arith.constant 0 : i32
    %33 = vector.broadcast %c0_i32_18 : i32 to vector<128x1xi32>
    %34 = arith.cmpi sge, %29, %33 : vector<128x1xi32>
    %c128_i32_19 = arith.constant 128 : i32
    %35 = vector.broadcast %c128_i32_19 : i32 to vector<128x1xi32>
    %36 = arith.cmpi slt, %29, %35 : vector<128x1xi32>
    %37 = arith.andi %34, %36 : vector<128x1xi1>
    %c0_20 = arith.constant 0 : index
    %c0_21 = arith.constant 0 : index
    %38 = vector.load %arg9[%c0_20, %c0_21] : memref<128x1xf32, #tpu.memory_space<vmem>>, vector<128x1xf32>
    %cst_22 = arith.constant 0.000000e+00 : f32
    %39 = vector.broadcast %cst_22 : f32 to vector<128x128xf32>
    %40 = arith.select %32, %18, %39 : vector<128x128xi1>, vector<128x128xf32>
    %cst_23 = arith.constant dense<0.000000e+00> : vector<128xf32>
    %41 = vector.multi_reduction <add>, %40, %cst_23 [1] : vector<128x128xf32> to vector<128xf32>
    %42 = vector.shape_cast %41 : vector<128xf32> to vector<128x1xf32>
    %43 = arith.addf %38, %42 : vector<128x1xf32>
    %cst_24 = arith.constant 0.000000e+00 : f32
    %44 = vector.broadcast %cst_24 : f32 to vector<128x1xf32>
    %45 = arith.select %37, %13, %44 : vector<128x1xi1>, vector<128x1xf32>
    %46 = arith.addf %43, %45 : vector<128x1xf32>
    %c0_25 = arith.constant 0 : index
    %c0_26 = arith.constant 0 : index
    %47 = vector.load %arg9[%c0_25, %c0_26] : memref<128x1xf32, #tpu.memory_space<vmem>>, vector<128x1xf32>
    tpu.vector_store %arg9[%c0_25, %c0_26], %46 {strides = array<i32>} : memref<128x1xf32, #tpu.memory_space<vmem>>, vector<128x1xf32>,
    %c0_27 = arith.constant 0 : index
    %c0_28 = arith.constant 0 : index
    %48 = vector.load %arg7[%c0_27, %c0_28] : memref<128x1xf32, #tpu.memory_space<vmem>>, vector<128x1xf32>
    tpu.vector_store %arg7[%c0_27, %c0_28], %13 {strides = array<i32>} : memref<128x1xf32, #tpu.memory_space<vmem>>, vector<128x1xf32>,
    %c3_i32 = arith.constant 3 : i32
    %49 = arith.cmpi eq, %arg1, %c3_i32 : i32
    %50 = arith.extui %49 : i1 to i32
    %c0_i32_29 = arith.constant 0 : i32
    %51 = arith.cmpi ne, %50, %c0_i32_29 : i32
    scf.if %51 {
      %c0_30 = arith.constant 0 : index
      %c0_31 = arith.constant 0 : index
      %52 = vector.load %arg7[%c0_30, %c0_31] : memref<128x1xf32, #tpu.memory_space<vmem>>, vector<128x1xf32>
      %c0_32 = arith.constant 0 : index
      %c0_33 = arith.constant 0 : index
      %53 = vector.load %arg8[%c0_32, %c0_33] : memref<128x1xf32, #tpu.memory_space<vmem>>, vector<128x1xf32>
      %54 = math.log %53 : vector<128x1xf32>
      %55 = arith.addf %52, %54 : vector<128x1xf32>
      %c0_34 = arith.constant 0 : index
      %c0_35 = arith.constant 0 : index
      %56 = vector.load %arg5[%c0_34, %c0_35] : memref<128x1xi32, #tpu.memory_space<vmem>>, vector<128x1xi32>
      %c-1_i32 = arith.constant -1 : i32
      %57 = vector.broadcast %c-1_i32 : i32 to vector<128x1xi32>
      %58 = arith.cmpi ne, %56, %57 : vector<128x1xi32>
      %c0_36 = arith.constant 0 : index
      %c0_37 = arith.constant 0 : index
      %59 = vector.load %arg9[%c0_36, %c0_37] : memref<128x1xf32, #tpu.memory_space<vmem>>, vector<128x1xf32>
      %60 = arith.subf %55, %59 : vector<128x1xf32>
      %cst_38 = arith.constant 0.000000e+00 : f32
      %61 = vector.broadcast %cst_38 : f32 to vector<128x1xf32>
      %62 = arith.select %58, %60, %61 : vector<128x1xi1>, vector<128x1xf32>
      %63 = vector.shape_cast %62 : vector<128x1xf32> to vector<1x128x1xf32>
      %cst_39 = arith.constant dense<0.000000e+00> : vector<1xf32>
      %64 = vector.multi_reduction <add>, %63, %cst_39 [1, 2] : vector<1x128x1xf32> to vector<1xf32>
      %65 = vector.shape_cast %64 : vector<1xf32> to vector<1x1x1xf32>
      %66 = vector.extract %65[0, 0, 0] : f32 from vector<1x1x1xf32>
      %67 = arith.extui %58 : vector<128x1xi1> to vector<128x1xi32>
      %68 = arith.sitofp %67 : vector<128x1xi32> to vector<128x1xf32>
      %69 = vector.shape_cast %68 : vector<128x1xf32> to vector<1x128x1xf32>
      %cst_40 = arith.constant dense<0.000000e+00> : vector<1xf32>
      %70 = vector.multi_reduction <add>, %69, %cst_40 [1, 2] : vector<1x128x1xf32> to vector<1xf32>
      %71 = vector.shape_cast %70 : vector<1xf32> to vector<1x1x1xf32>
      %72 = vector.extract %71[0, 0, 0] : f32 from vector<1x1x1xf32>
      %73 = tpu.iota {dimensions = array<i32: 2>} : vector<1x1x128xi32>
      %c0_i32_41 = arith.constant 0 : i32
      %74 = vector.broadcast %c0_i32_41 : i32 to vector<1x1x128xi32>
      %75 = arith.cmpi eq, %73, %74 : vector<1x1x128xi32>
      %cst_42 = arith.constant 0.000000e+00 : f32
      %76 = vector.broadcast %66 : f32 to vector<1x1x128xf32>
      %77 = vector.broadcast %cst_42 : f32 to vector<1x1x128xf32>
      %78 = arith.select %75, %76, %77 : vector<1x1x128xi1>, vector<1x1x128xf32>
      %c1_i32 = arith.constant 1 : i32
      %79 = vector.broadcast %c1_i32 : i32 to vector<1x1x128xi32>
      %80 = arith.cmpi eq, %73, %79 : vector<1x1x128xi32>
      %cst_43 = arith.constant 0.000000e+00 : f32
      %81 = vector.broadcast %72 : f32 to vector<1x1x128xf32>
      %82 = vector.broadcast %cst_43 : f32 to vector<1x1x128xf32>
      %83 = arith.select %80, %81, %82 : vector<1x1x128xi1>, vector<1x1x128xf32>
      %84 = arith.addf %78, %83 : vector<1x1x128xf32>
      %c0_44 = arith.constant 0 : index
      %c0_45 = arith.constant 0 : index
      %c0_46 = arith.constant 0 : index
      %85 = vector.load %arg6[%c0_44, %c0_45, %c0_46] : memref<1x1x128xf32, #tpu.memory_space<vmem>>, vector<1x1x128xf32>
      tpu.vector_store %arg6[%c0_44, %c0_45, %c0_46], %84 {strides = array<i32>} : memref<1x1x128xf32, #tpu.memory_space<vmem>>, vector<1x1x128xf32>,
    } else {
    }
    return
  }
  func.func @transform_0(%arg0: i32, %arg1: i32) -> (i32, i32) {
    %c0_i32 = arith.constant 0 : i32
    %c0_i32_0 = arith.constant 0 : i32
    return %arg0, %c0_i32 : i32, i32
  }
  func.func @transform_1(%arg0: i32, %arg1: i32) -> (i32, i32) {
    %c0_i32 = arith.constant 0 : i32
    %c0_i32_0 = arith.constant 0 : i32
    return %c0_i32, %arg1 : i32, i32
  }
  func.func @transform_2(%arg0: i32, %arg1: i32) -> (i32, i32) {
    %c0_i32 = arith.constant 0 : i32
    %c0_i32_0 = arith.constant 0 : i32
    return %c0_i32, %arg1 : i32, i32
  }
  func.func @transform_3(%arg0: i32, %arg1: i32) -> (i32, i32) {
    %c0_i32 = arith.constant 0 : i32
    %c0_i32_0 = arith.constant 0 : i32
    return %arg0, %c0_i32 : i32, i32
  }
  func.func @transform_4(%arg0: i32, %arg1: i32) -> (i32, i32, i32) {
    %c0_i32 = arith.constant 0 : i32
    %c0_i32_0 = arith.constant 0 : i32
    %c0_i32_1 = arith.constant 0 : i32
    return %arg0, %c0_i32, %c0_i32_0 : i32, i32, i32
  }
}

</mosaic_0001>

<bundles_post_ra>
// kernel: tpu_custom_call.1
= control target key start
LH: loop header
LB: loop body
LE: loop exit
PB: predicated region body
PF: predicated region fallthrough
CT: control target
= control target key end

     0   :  { %s2853_s0 = inlined_call_operand.vmem [shape: f32[256,32], index: 0, kind: input, shape index: {}]   ;;  %s2854_s1 = inlined_call_operand.vmem [shape: bf16[32,512], index: 1, kind: input, shape index: {}]   ;;  %s2855_s2 = inlined_call_operand.vmem [shape: f32[1,512], index: 2, kind: input, shape index: {}]   ;;  %s2856_s3 = inlined_call_operand.vmem [shape: s32[256,1], index: 3, kind: input, shape index: {}]   ;;  %s2857_s4 = inlined_call_operand.hbm [shape: f32[2,1,128], index: 4, kind: output, shape index: {}]  }
   0x1   :  { %2906 = sst [smem:[#allocation40_spill]] %s2854_s1 }
   0x2   :  { %9 = vsyncpa [#allocation7], 0 }
   0x3   :  { %11 = vsyncpa [#allocation7 + $0x1], 0  ;;  %s1916_s15 = smov 0   ;;  %s1918_s16 = smov 0  }
   0x4   :  { %s1920_s17 = smov 0   ;;  %s1922_s18 = smov 0  }
   0x5   :  { %s1924_s19 = smov 0   ;;  %s1926_s20 = smov 0  }
   0x6   :  { %s1928_s21 = smov 0   ;;  %s1930_s22 = smov 0  }
   0x7   :  { %s1932_s23 = smov 0   ;;  %s1934_s24 = smov 0  }
   0x8 LB: > { %2907 = sst [smem:[#allocation9_spill]] %s1877_s22  ;;  %s1523_s25 = sadd.s32 4294967295, %s1885_s24   ;;  %s1885_s24 = sphi %s1934_s24, %s17_s24   ;;  %s1881_s23 = sphi %s1932_s23, %s2992_s23   ;;  %s1877_s22 = sphi %s1930_s22, %s2991_s22   ;;  %s1873_s21 = sphi %s1928_s21, %s2990_s21   ;;  %s1869_s20 = sphi %s1926_s20, %s2989_s20   ;;  %s1865_s19 = sphi %s1924_s19, %s2997_s19   ;;  %s1861_s18 = sphi %s1922_s18, %s2996_s18   ;;  %s1857_s17 = sphi %s1920_s17, %s2995_s17   ;;  %s1853_s16 = sphi %s1918_s16, %s2994_s16   ;;  %s1849_s15 = sphi %s1916_s15, %s2993_s15  }
   0x9   : > { %2908 = sst [smem:[#allocation10_spill]] %s1881_s23  ;;  %s1524_s26 = sadd.s32 4294967294, %s1885_s24  }
   0xa   : > { %s26_s27 = sadd.s32 1, %s1877_s22  ;;  %s29_s28 = sadd.s32 1, %s1881_s23 }
   0xb   : > { %p27_p0 = scmp.ge.s32.totalorder %s26_s27, 4  ;;  %s62_s29 = sadd.s32 1, %s1865_s19 }
   0xc   : > { %p69_p1 = scmp.ne.s32.totalorder %s1865_s19, %s1861_s18  ;;  %p70_p2 = scmp.eq.s32.totalorder %s1885_s24, 0 }
   0xd   : > { %s2999_s27 = smov (%p27_p0, %s26_s27), 0  ;;  %s3001_s28 = smov (!%p27_p0, %s29_s28), %s1881_s23 }
   0xe   : > { %2909 = sst [smem:[#allocation11_spill]] %s2999_s27  ;;  %s59_s30 = ssub.s32 %s1877_s22, %s2999_s27 }
   0xf   : > { %p1979_p3 = por %p70_p2, %p69_p1  ;;  %p31_p4 = scmp.ge.s32.totalorder %s3001_s28, 2 }
  0x10   : > { %p60_p5 = scmp.eq.s32.totalorder %s59_s30, 0  ;;  %s140_s6 = sadd.s32 1, %s1857_s17 }
  0x11   : > { %p150_p6 = scmp.ne.s32.totalorder %s1857_s17, %s1853_s16  ;;  %s3003_s28 = smov (%p31_p4, %s3001_s28), 0 }
  0x12   : > { %2911 = sst [smem:[#allocation12_spill]] %s3003_s28  ;;  %s137_s8 = ssub.s32 %s1881_s23, %s3003_s28 }
  0x13   : > { %s1989_s7 = scalar_select %p60_p5, %s1865_s19, %s62_s29  }
  0x14   : > { %p151_p7 = scmp.eq.s32.totalorder %s1523_s25, 7  ;;  %p138_p8 = scmp.eq.s32.totalorder %s137_s8, 0 }
  0x15   : > { %p156_p9 = scmp.ne.s32.totalorder %s1853_s16, %s1849_s15  ;;  %p157_p11 = scmp.eq.s32.totalorder %s1524_s26, 7 }
  0x16   : > { %p1995_p10 = por %p151_p7, %p150_p6  ;;  %p1526_p13 = scmp.ge.s32.totalorder %s1885_s24, 8 }
  0x17   : > { %s2000_s10 = scalar_select %p138_p8, %s1857_s17, %s140_s6  }
  0x18   : > { %p2002_p12 = por %p157_p11, %p156_p9  ;;  %173 = sbr.rel (%p1526_p13) target bundleno = 43 (0x2b), region = 16 }
  0x1d   : > { %185 = sbr.rel (!%p1979_p3) target bundleno = 43 (0x2b), region = 24  ;;  %s187_s12 = sand.u32 (%p1979_p3), 1, %s1865_s19  }
  0x1e   : > { %s1528_s13 = sshll.u32 (%p1979_p3), %s1877_s22, 2  ;;  %s1527_s14 = sshll.u32 (%p1979_p3), %s187_s12, 4 }
  0x1f   : > { %s2914_s1 = sld [smem:[#allocation40_spill]] (%p1979_p3)  ;;  %s189_s30 = scalar_lea.vmem (%p1979_p3), [#allocation5], %s1527_s14 }
  0x25   : > { %s191_s26 = scalar_lea.vmem %s2914_s1, %s1528_s13 }
  0x26   : > { %v208_v0 = vld [vmem:[%s191_s26] sm:$0xf]  ;;  %v210_v1 = vld [vmem:[%s191_s26 + $0x10] sm:$0xf] }
  0x27   : > { %209 = vst [vmem:[%s189_s30] sm:$0xf] %v208_v0  ;;  %v212_v2 = vld [vmem:[%s191_s26 + $0x20] sm:$0xf]  ;;  %v214_v3 = vld [vmem:[%s191_s26 + $0x30] sm:$0xf] }
  0x28   : > { %211 = vst [vmem:[%s189_s30 + $0x4] sm:$0xf] %v210_v1 }
  0x29   : > { %213 = vst [vmem:[%s189_s30 + $0x8] sm:$0xf] %v212_v2 }
  0x2a   : > { %215 = vst [vmem:[%s189_s30 + $0xc] sm:$0xf] %v214_v3 }
  0x2b PF: > { %p1529_p0 = scmp.ge.s32.totalorder %s1885_s24, 1  ;;  %p261_p1 = scmp.lt.s32.totalorder %s1885_s24, 9 }
  0x2d   : > { %p262_p2 = pnand %p1529_p0, %p261_p1 }
  0x2f   : > { %265 = sbr.rel (%p262_p2) target bundleno = 956 (0x3bc), region = 73 }
  0x34   : > { %s268_s5 = sand.u32 1, %s1861_s18   ;;  %s1531_s12 = sshll.u32 %s1873_s21, 4 }
  0x35   : > { %s2018_s8 = sshll.u32 %s268_s5, 4  ;;  %p306_p3 = scmp.lt.s32.totalorder %s1531_s12, 31 }
  0x36   : > { %p311_p4 = scmp.lt.s32.totalorder %s1869_s20, 3  ;;  %s270_s27 = scalar_lea.vmem [#allocation5], %s2018_s8 }
  0x37   : > { %s3005_s12 = smov (!%p306_p3, %s1531_s12), 31  ;;  %s2915_s23 = sand.u32 1, %s1853_s16  }
  0x38   : > { %s2023_s13 = scalar_select %p311_p4, %s1869_s20, 3 }
  0x39   : > { %s1532_s14 = sshll.u32 %s3005_s12, 3  ;;  %s2042_s22 = scalar_lea.vmem [#allocation6], %s2915_s23 }
  0x3a   : > { %s2028_s26 = scalar_lea.vmem %s2853_s0, %s1532_s14  ;;  %s313_s18 = scalar_lea.vmem %s2855_s2, %s2023_s13 }
  0x3b   : > { %s2037_s28 = scalar_lea.vmem %s2856_s3, %s1532_s14  ;;  %p1535_p5 = scmp.ne.s32.totalorder %s1869_s20, 0 }
  0x3d   : > { %324 = sbr.rel (%p1535_p5) target bundleno = 115 (0x73), region = 81 }
  0x42   : > { %vm325_vm0 = vcmask 7168   ;;  %v1887_v4 = vmov -1e+30   ;;  %v1888_v5 = vmov 0.0  }
  0x43   : > { %326 = vst.msk [vmem:[#allocation2] sm:$0xff] %vm325_vm0, %v1887_v4 }
  0x44   : > { %327 = vst.msk [vmem:[#allocation2 + $0x8] sm:$0xff] %vm325_vm0, %v1887_v4 }
  0x45   : > { %328 = vst.msk [vmem:[#allocation2 + $0x10] sm:$0xff] %vm325_vm0, %v1887_v4 }
  0x46   : > { %329 = vst.msk [vmem:[#allocation2 + $0x18] sm:$0xff] %vm325_vm0, %v1887_v4 }
  0x47   : > { %330 = vst.msk [vmem:[#allocation2 + $0x20] sm:$0xff] %vm325_vm0, %v1887_v4 }
  0x48   : > { %331 = vst.msk [vmem:[#allocation2 + $0x28] sm:$0xff] %vm325_vm0, %v1887_v4 }
  0x49   : > { %332 = vst.msk [vmem:[#allocation2 + $0x30] sm:$0xff] %vm325_vm0, %v1887_v4 }
  0x4a   : > { %333 = vst.msk [vmem:[#allocation2 + $0x38] sm:$0xff] %vm325_vm0, %v1887_v4 }
  0x4b   : > { %334 = vst.msk [vmem:[#allocation2 + $0x40] sm:$0xff] %vm325_vm0, %v1887_v4 }
  0x4c   : > { %335 = vst.msk [vmem:[#allocation2 + $0x48] sm:$0xff] %vm325_vm0, %v1887_v4 }
  0x4d   : > { %336 = vst.msk [vmem:[#allocation2 + $0x50] sm:$0xff] %vm325_vm0, %v1887_v4 }
  0x4e   : > { %337 = vst.msk [vmem:[#allocation2 + $0x58] sm:$0xff] %vm325_vm0, %v1887_v4 }
  0x4f   : > { %338 = vst.msk [vmem:[#allocation2 + $0x60] sm:$0xff] %vm325_vm0, %v1887_v4 }
  0x50   : > { %339 = vst.msk [vmem:[#allocation2 + $0x68] sm:$0xff] %vm325_vm0, %v1887_v4 }
  0x51   : > { %340 = vst.msk [vmem:[#allocation2 + $0x70] sm:$0xff] %vm325_vm0, %v1887_v4 }
  0x52   : > { %341 = vst.msk [vmem:[#allocation2 + $0x78] sm:$0xff] %vm325_vm0, %v1887_v4 }
  0x53   : > { %342 = vst.msk [vmem:[#allocation3] sm:$0xff] %vm325_vm0, %v1888_v5 }
  0x54   : > { %343 = vst.msk [vmem:[#allocation3 + $0x8] sm:$0xff] %vm325_vm0, %v1888_v5 }
  0x55   : > { %344 = vst.msk [vmem:[#allocation3 + $0x10] sm:$0xff] %vm325_vm0, %v1888_v5 }
  0x56   : > { %345 = vst.msk [vmem:[#allocation3 + $0x18] sm:$0xff] %vm325_vm0, %v1888_v5 }
  0x57   : > { %346 = vst.msk [vmem:[#allocation3 + $0x20] sm:$0xff] %vm325_vm0, %v1888_v5 }
  0x58   : > { %347 = vst.msk [vmem:[#allocation3 + $0x28] sm:$0xff] %vm325_vm0, %v1888_v5 }
  0x59   : > { %348 = vst.msk [vmem:[#allocation3 + $0x30] sm:$0xff] %vm325_vm0, %v1888_v5 }
  0x5a   : > { %349 = vst.msk [vmem:[#allocation3 + $0x38] sm:$0xff] %vm325_vm0, %v1888_v5 }
  0x5b   : > { %350 = vst.msk [vmem:[#allocation3 + $0x40] sm:$0xff] %vm325_vm0, %v1888_v5 }
  0x5c   : > { %351 = vst.msk [vmem:[#allocation3 + $0x48] sm:$0xff] %vm325_vm0, %v1888_v5 }
  0x5d   : > { %352 = vst.msk [vmem:[#allocation3 + $0x50] sm:$0xff] %vm325_vm0, %v1888_v5 }
  0x5e   : > { %353 = vst.msk [vmem:[#allocation3 + $0x58] sm:$0xff] %vm325_vm0, %v1888_v5 }
  0x5f   : > { %354 = vst.msk [vmem:[#allocation3 + $0x60] sm:$0xff] %vm325_vm0, %v1888_v5 }
  0x60   : > { %355 = vst.msk [vmem:[#allocation3 + $0x68] sm:$0xff] %vm325_vm0, %v1888_v5 }
  0x61   : > { %356 = vst.msk [vmem:[#allocation3 + $0x70] sm:$0xff] %vm325_vm0, %v1888_v5 }
  0x62   : > { %357 = vst.msk [vmem:[#allocation3 + $0x78] sm:$0xff] %vm325_vm0, %v1888_v5 }
  0x63   : > { %358 = vst.msk [vmem:[#allocation4] sm:$0xff] %vm325_vm0, %v1888_v5 }
  0x64   : > { %359 = vst.msk [vmem:[#allocation4 + $0x8] sm:$0xff] %vm325_vm0, %v1888_v5 }
  0x65   : > { %360 = vst.msk [vmem:[#allocation4 + $0x10] sm:$0xff] %vm325_vm0, %v1888_v5 }
  0x66   : > { %361 = vst.msk [vmem:[#allocation4 + $0x18] sm:$0xff] %vm325_vm0, %v1888_v5 }
  0x67   : > { %362 = vst.msk [vmem:[#allocation4 + $0x20] sm:$0xff] %vm325_vm0, %v1888_v5 }
  0x68   : > { %363 = vst.msk [vmem:[#allocation4 + $0x28] sm:$0xff] %vm325_vm0, %v1888_v5 }
  0x69   : > { %364 = vst.msk [vmem:[#allocation4 + $0x30] sm:$0xff] %vm325_vm0, %v1888_v5 }
  0x6a   : > { %365 = vst.msk [vmem:[#allocation4 + $0x38] sm:$0xff] %vm325_vm0, %v1888_v5 }
  0x6b   : > { %366 = vst.msk [vmem:[#allocation4 + $0x40] sm:$0xff] %vm325_vm0, %v1888_v5 }
  0x6c   : > { %367 = vst.msk [vmem:[#allocation4 + $0x48] sm:$0xff] %vm325_vm0, %v1888_v5 }
  0x6d   : > { %368 = vst.msk [vmem:[#allocation4 + $0x50] sm:$0xff] %vm325_vm0, %v1888_v5 }
  0x6e   : > { %369 = vst.msk [vmem:[#allocation4 + $0x58] sm:$0xff] %vm325_vm0, %v1888_v5 }
  0x6f   : > { %370 = vst.msk [vmem:[#allocation4 + $0x60] sm:$0xff] %vm325_vm0, %v1888_v5 }
  0x70   : > { %371 = vst.msk [vmem:[#allocation4 + $0x68] sm:$0xff] %vm325_vm0, %v1888_v5 }
  0x71   : > { %372 = vst.msk [vmem:[#allocation4 + $0x70] sm:$0xff] %vm325_vm0, %v1888_v5 }
  0x72   : > { %373 = vst.msk [vmem:[#allocation4 + $0x78] sm:$0xff] %vm325_vm0, %v1888_v5 }
  0x73 PF: > { %v1573_v6 = vld [vmem:[%s270_s27 + $0x8] sm:$0xff]  ;;  %v1572_v7 = vld [vmem:[%s270_s27] sm:$0xff]  ;;  %s1552_s1 = sshll.u32 %s1869_s20, 7  ;;  %v1889_v11 = vmov 0   ;;  %vm418_vm1 = vcmask 261120   ;;  %vm812_vm2 = vcmask 7168  }
  0x74   : > { %v374_v8 = vld [vmem:[%s2028_s26] sm:$0xff]  ;;  %v375_v9 = vld [vmem:[%s2028_s26 + $0x8] sm:$0xff]  ;;  %1677 = vset.pattern.permute.xlu0 %v1889_v11  ;;  %v2101_v12 = vstv %s1552_s1  ;;  %1676 = vset.pattern.permute.xlu2 %v1889_v11  ;;  %v831_v18 = vld [vmem:[%s2037_s28 + $0x10] sm:$0xff]  ;;  %p1553_p6 = scmp.ne.s32.totalorder %s1869_s20, 3 }
  0x75   : > { %v378_v10 = vld [vmem:[%s2028_s26 + $0x20] sm:$0xff]  ;;  %449 = vmatpush.bf16.msra.mxu0 %v1573_v6  ;;  %1574 = vmatpush.bf16.msra.mxu1 %v1573_v6  ;;  %v379_v13 = vld [vmem:[%s2028_s26 + $0x28] sm:$0xff]  ;;  %v2110_v19 = vsub.s32 %v831_v18, %v2101_v12  ;;  %v390_v20 = vpack.c.bf16 %v375_v9, %v374_v8  ;;  %v832_v31 = vld [vmem:[%s2037_s28 + $0x18] sm:$0xff] }
  0x76   : > { %v386_v14 = vld [vmem:[%s2028_s26 + $0x60] sm:$0xff]  ;;  %v387_v15 = vld [vmem:[%s2028_s26 + $0x68] sm:$0xff]  ;;  %1576 = vmatpush.bf16.msra.mxu3 %v1573_v6  ;;  %1575 = vmatpush.bf16.msra.mxu2 %v1573_v6  ;;  %v392_v21 = vpack.c.bf16 %v379_v13, %v378_v10  ;;  %v2137_v33 = vsub.s32 %v832_v31, %v2101_v12  ;;  %v376_v34 = vld [vmem:[%s2028_s26 + $0x10] sm:$0xff] }
  0x77   : > { %v382_v16 = vld [vmem:[%s2028_s26 + $0x40] sm:$0xff]  ;;  %v383_v17 = vld [vmem:[%s2028_s26 + $0x48] sm:$0xff]  ;;  %2916 = vst [vmem:[#allocation13_spill] sm:$0xff] %v2110_v19  ;;  %1675 = vset.pattern.permute.xlu1 %v1889_v11  ;;  %v396_v22 = vpack.c.bf16 %v387_v15, %v386_v14  ;;  %872 = vperm.xlu0 %1677, %v2110_v19   ;;  %v377_v35 = vld [vmem:[%s2028_s26 + $0x18] sm:$0xff] }
  0x78   : > { %v394_v23 = vpack.c.bf16 %v383_v17, %v382_v16  ;;  %v830_v24 = vld [vmem:[%s2037_s28 + $0x8] sm:$0xff]  ;;  %v829_v26 = vld [vmem:[%s2037_s28] sm:$0xff]  ;;  %2918 = vst [vmem:[#allocation15_spill] sm:$0xff] %v2137_v33  ;;  %v836_v36 = vld [vmem:[%s2037_s28 + $0x38] sm:$0xff]  ;;  %v391_v46 = vpack.c.bf16 %v377_v35, %v376_v34 }
  0x79   : > { %450 = vmatpush.bf16.msra.mxu0 %v1572_v7  ;;  %1577 = vmatpush.bf16.msra.mxu1 %v1572_v7  ;;  %v2114_v25 = vsub.s32 %v830_v24, %v2101_v12  ;;  %v833_v27 = vld [vmem:[%s2037_s28 + $0x20] sm:$0xff]  ;;  %v2122_v28 = vsub.s32 %v829_v26, %v2101_v12  ;;  %v834_v30 = vld [vmem:[%s2037_s28 + $0x28] sm:$0xff]  ;;  %v384_v37 = vld [vmem:[%s2028_s26 + $0x50] sm:$0xff]  ;;  %v2152_v43 = vsub.s32 %v836_v36, %v2101_v12 }
  0x7a   : > { %1579 = vmatpush.bf16.msra.mxu3 %v1572_v7  ;;  %1578 = vmatpush.bf16.msra.mxu2 %v1572_v7  ;;  %v2129_v29 = vsub.s32 %v833_v27, %v2101_v12  ;;  %v2134_v32 = vsub.s32 %v834_v30, %v2101_v12  ;;  %v380_v38 = vld [vmem:[%s2028_s26 + $0x30] sm:$0xff]  ;;  %v381_v39 = vld [vmem:[%s2028_s26 + $0x38] sm:$0xff]  ;;  %v837_v44 = vld [vmem:[%s2037_s28 + $0x40] sm:$0xff] }
  0x7b   : > { %869 = vperm.xlu2 %1676, %v2114_v25   ;;  %866 = vperm.xlu1 %1675, %v2122_v28   ;;  %v385_v40 = vld [vmem:[%s2028_s26 + $0x58] sm:$0xff]  ;;  %v388_v41 = vld [vmem:[%s2028_s26 + $0x70] sm:$0xff]  ;;  %2919 = vst [vmem:[#allocation16_spill] sm:$0xff] %v2152_v43  ;;  %v393_v47 = vpack.c.bf16 %v381_v39, %v380_v38  ;;  %v2157_v50 = vsub.s32 %v837_v44, %v2101_v12  ;;  %v838_v55 = vld [vmem:[%s2037_s28 + $0x48] sm:$0xff] }
  0x7c   : > { %1544 = vmatmul.msk.bf16.vlgmr.msra.gmra.mxu0 %vm418_vm1, %v390_v20  ;;  %1546 = vmatmul.msk.bf16.vlgmr.msra.gmra.mxu1 %vm418_vm1, %v392_v21  ;;  %2917 = vst [vmem:[#allocation14_spill] sm:$0xff] %v2134_v32  ;;  %v389_v42 = vld [vmem:[%s2028_s26 + $0x78] sm:$0xff]  ;;  %v835_v45 = vld [vmem:[%s2037_s28 + $0x30] sm:$0xff]  ;;  %v395_v48 = vpack.c.bf16 %v385_v40, %v384_v37  ;;  %v2179_v57 = vsub.s32 %v838_v55, %v2101_v12  ;;  %v842_v58 = vld [vmem:[%s2037_s28 + $0x68] sm:$0xff] }
  0x7d   : > { %1550 = vmatmul.msk.bf16.vlgmr.msra.gmra.mxu3 %vm418_vm1, %v396_v22  ;;  %1548 = vmatmul.msk.bf16.vlgmr.msra.gmra.mxu2 %vm418_vm1, %v394_v23  ;;  %v397_v49 = vpack.c.bf16 %v389_v42, %v388_v41  ;;  %v2160_v51 = vsub.s32 %v835_v45, %v2101_v12  ;;  %v839_v52 = vld [vmem:[%s2037_s28 + $0x50] sm:$0xff]  ;;  %v840_v54 = vld [vmem:[%s2037_s28 + $0x58] sm:$0xff]  ;;  %v2186_v59 = vsub.s32 %v842_v58, %v2101_v12  ;;  %v841_v61 = vld [vmem:[%s2037_s28 + $0x60] sm:$0xff] }
  0x7e   : > { %v2171_v53 = vsub.s32 %v839_v52, %v2101_v12  ;;  %v2176_v56 = vsub.s32 %v840_v54, %v2101_v12  ;;  %v843_v60 = vld [vmem:[%s2037_s28 + $0x70] sm:$0xff]  ;;  %v2194_v63 = vsub.s32 %v841_v61, %v2101_v12  ;;  %v844_v0 = vld [vmem:[%s2037_s28 + $0x78] sm:$0xff]  ;;  %v1678_v2 = vld [vmem:[%s313_s18] ss:$0 sm:$0xff] }
  0x7f   : > { %878 = vperm.xlu0 %1677, %v2129_v29   ;;  %2920 = vst [vmem:[#allocation17_spill] sm:$0xff] %v2160_v51  ;;  %v2191_v62 = vsub.s32 %v843_v60, %v2101_v12  ;;  %v2201_v1 = vsub.s32 %v844_v0, %v2101_v12  ;;  %v2390_v19 = vld [vmem:[#allocation2 + $0x58] sm:$0xff] }
  0x80   : > { %2921 = vst [vmem:[#allocation18_spill] sm:$0xff] %v2171_v53 }
  0x81   : > { %2922 = vst [vmem:[#allocation19_spill] sm:$0xff] %v2176_v56 }
  0x82   : > { %2923 = vst [vmem:[#allocation20_spill] sm:$0xff] %v2186_v59 }
  0x83   : > { %881 = vperm.xlu2 %1676, %v2134_v32   ;;  %875 = vperm.xlu1 %1675, %v2137_v33   ;;  %2924 = vst [vmem:[#allocation21_spill] sm:$0xff] %v2191_v62 }
  0x84   : > { %2925 = vst [vmem:[#allocation22_spill] sm:$0xff] %v2201_v1 }
  0x85   : > { %2935 = vst [vmem:[#allocation32_spill] sm:$0xff] %v2390_v19 }
  0x87   : > { %887 = vperm.xlu0 %1677, %v2152_v43  }
  0x8b   : > { %890 = vperm.xlu2 %1676, %v2157_v50   ;;  %884 = vperm.xlu1 %1675, %v2160_v51  }
  0x8c   : > { %1545 = vmatmul.msk.bf16.gmra.mxu0 %vm418_vm1, %v391_v46  ;;  %1547 = vmatmul.msk.bf16.gmra.mxu1 %vm418_vm1, %v393_v47 }
  0x8d   : > { %1549 = vmatmul.msk.bf16.gmra.mxu2 %vm418_vm1, %v395_v48  ;;  %1551 = vmatmul.msk.bf16.gmra.mxu3 %vm418_vm1, %v397_v49 }
  0x8f   : > { %896 = vperm.xlu0 %1677, %v2171_v53  }
  0x93   : > { %899 = vperm.xlu2 %1676, %v2176_v56   ;;  %893 = vperm.xlu1 %1675, %v2179_v57  }
  0x97   : > { %905 = vperm.xlu0 %1677, %v2186_v59   ;;  %v2361_v59 = vld [vmem:[#allocation2 + $0x70] sm:$0xff] }
  0x98   : > { %2930 = vst [vmem:[#allocation27_spill] sm:$0xff] %v2361_v59 }
  0x9b   : > { %908 = vperm.xlu2 %1676, %v2191_v62   ;;  %902 = vperm.xlu1 %1675, %v2194_v63  }
  0xa3   : > { %911 = vperm.xlu1 %1675, %v2201_v1  }
  0xd5   : > { %v2257_v41 = vpop.permute.xlu2 %869 }
  0xdd   : > { %v2263_v45 = vpop.permute.xlu2 %881 }
  0xe5   : > { %v2269_v48 = vpop.permute.xlu2 %890 }
  0xe9   : > { %v2259_v42 = vpop.permute.xlu0 %872 }
  0xed   : > { %v2261_v44 = vpop.permute.xlu1 %866  ;;  %v2275_v54 = vpop.permute.xlu2 %899 }
  0xf1   : > { %v2265_v46 = vpop.permute.xlu0 %878 }
  0xf5   : > { %v2267_v47 = vpop.permute.xlu1 %875  ;;  %v2281_v60 = vpop.permute.xlu2 %908 }
  0xf9   : > { %v452_v3 = vpop.f32.mrf.mxu0  ;;  %v462_v4 = vpop.f32.mrf.mxu1 }
  0xfa   : > { %v2209_v5 = vadd.f32 %v1678_v2, %v452_v3  ;;  %v2211_v6 = vadd.f32 %v1678_v2, %v462_v4  ;;  %v2271_v49 = vpop.permute.xlu0 %887  ;;  %v2289_v3 = vld [vmem:[#allocation2] sm:$0xff] }
  0xfc   : > { %500 = vmax.xlane.f32.xlu2 %v2211_v6  ;;  %492 = vmax.xlane.f32.xlu0 %v2209_v5 }
  0xfd   : > { %v2273_v52 = vpop.permute.xlu1 %884 }
 0x100   : > { %v482_v7 = vpop.f32.mrf.mxu3  ;;  %v472_v8 = vpop.f32.mrf.mxu2 }
 0x101   : > { %v2215_v9 = vadd.f32 %v1678_v2, %v482_v7  ;;  %v2217_v10 = vadd.f32 %v1678_v2, %v472_v8  ;;  %v454_v11 = vpop.f32.mrf.mxu0  ;;  %v464_v12 = vpop.f32.mrf.mxu1 }
 0x102   : > { %v2223_v16 = vadd.f32 %v1678_v2, %v454_v11  ;;  %v2225_v17 = vadd.f32 %v1678_v2, %v464_v12  ;;  %v2277_v55 = vpop.permute.xlu0 %896 }
 0x104   : > { %508 = vmax.xlane.f32.xlu2 %v2217_v10  ;;  %516 = vmax.xlane.f32.xlu0 %v2215_v9 }
 0x105   : > { %v2279_v58 = vpop.permute.xlu1 %893 }
 0x108   : > { %v484_v13 = vpop.f32.mrf.mxu3  ;;  %v474_v14 = vpop.f32.mrf.mxu2 }
 0x109   : > { %v2221_v15 = vadd.f32 %v1678_v2, %v484_v13  ;;  %v457_v18 = vpop.f32.mrf.mxu0  ;;  %v2234_v24 = vadd.f32 %v1678_v2, %v474_v14  ;;  %v467_v26 = vpop.f32.mrf.mxu1  ;;  %v2306_v14 = vld [vmem:[#allocation2 + $0x40] sm:$0xff] }
 0x10a   : > { %v2230_v20 = vadd.f32 %v1678_v2, %v457_v18  ;;  %v2241_v30 = vadd.f32 %v1678_v2, %v467_v26  ;;  %v2283_v61 = vpop.permute.xlu0 %905  ;;  %v2308_v18 = vld [vmem:[#allocation2 + $0x60] sm:$0xff] }
 0x10b   : > { %518 = vmax.xlane.f32.xlu1 %v2221_v15 }
 0x10c   : > { %502 = vmax.xlane.f32.xlu2 %v2225_v17  ;;  %494 = vmax.xlane.f32.xlu0 %v2223_v16 }
 0x10d   : > { %v2285_v0 = vpop.permute.xlu1 %902 }
 0x110   : > { %v477_v21 = vpop.f32.mrf.mxu2  ;;  %v487_v22 = vpop.f32.mrf.mxu3 }
 0x111   : > { %v2232_v23 = vadd.f32 %v1678_v2, %v487_v22  ;;  %v2239_v27 = vadd.f32 %v1678_v2, %v477_v21  ;;  %v459_v35 = vpop.f32.mrf.mxu0  ;;  %v469_v39 = vpop.f32.mrf.mxu1 }
 0x112   : > { %v2248_v37 = vadd.f32 %v1678_v2, %v459_v35  ;;  %v2254_v40 = vadd.f32 %v1678_v2, %v469_v39 }
 0x113   : > { %496 = vmax.xlane.f32.xlu1 %v2230_v20 }
 0x114   : > { %510 = vmax.xlane.f32.xlu0 %v2234_v24  ;;  %520 = vmax.xlane.f32.xlu2 %v2232_v23 }
 0x115   : > { %v2310_v21 = vpop.permute.xlu1 %911 }
 0x118   : > { %v479_v31 = vpop.f32.mrf.mxu2  ;;  %v489_v36 = vpop.f32.mrf.mxu3 }
 0x119   : > { %v2243_v34 = vadd.f32 %v1678_v2, %v479_v31  ;;  %v2250_v38 = vadd.f32 %v1678_v2, %v489_v36  ;;  %v2287_v2 = vld [vmem:[#allocation2 + $0x20] sm:$0xff] }
 0x11b   : > { %512 = vmax.xlane.f32.xlu1 %v2239_v27 }
 0x11c   : > { %504 = vmax.xlane.f32.xlu0 %v2241_v30  ;;  %514 = vmax.xlane.f32.xlu2 %v2243_v34 }
 0x123   : > { %498 = vmax.xlane.f32.xlu1 %v2248_v37 }
 0x124   : > { %522 = vmax.xlane.f32.xlu0 %v2250_v38 }
 0x12b   : > { %506 = vmax.xlane.f32.xlu1 %v2254_v40 }
 0x16f   : > { %v501_v4 = vpop.xlane.xlu2 %500  ;;  %v493_v7 = vpop.xlane.xlu0 %492 }
 0x170   : > { %v2292_v8 = vmax.f32 %v2287_v2, %v501_v4  ;;  %v2295_v11 = vmax.f32 %v2289_v3, %v493_v7  ;;  %v2328_v4 = vld [vmem:[#allocation2 + $0x68] sm:$0xff] }
 0x171   : > { %2926 = vst [vmem:[#allocation23_spill] sm:$0xff] %v2328_v4  ;;  %v2330_v7 = vld [vmem:[#allocation2 + $0x28] sm:$0xff] }
 0x172   : > { %1109 = vst.msk [vmem:[#allocation2 + $0x20] sm:$0xff] %vm812_vm2, %v2292_v8  ;;  %606 = vperm.xlu1 %1675, %v2295_v11  }
 0x173   : > { %1105 = vst.msk [vmem:[#allocation2] sm:$0xff] %vm812_vm2, %v2295_v11 }
 0x177   : > { %v509_v22 = vpop.xlane.xlu2 %508  ;;  %v517_v26 = vpop.xlane.xlu0 %516 }
 0x178   : > { %v2313_v31 = vmax.f32 %v2306_v14, %v509_v22  ;;  %v2316_v35 = vmax.f32 %v2308_v18, %v517_v26  ;;  %v2332_v22 = vld [vmem:[#allocation2 + $0x8] sm:$0xff] }
 0x17a   : > { %1113 = vst.msk [vmem:[#allocation2 + $0x40] sm:$0xff] %vm812_vm2, %v2313_v31  ;;  %626 = vperm.xlu1 %1675, %v2292_v8   ;;  %666 = vperm.xlu0 %1677, %v2316_v35  }
 0x17b   : > { %1117 = vst.msk [vmem:[#allocation2 + $0x60] sm:$0xff] %vm812_vm2, %v2316_v35 }
 0x17e   : > { %v519_v26 = vpop.xlane.xlu1 %518 }
 0x17f   : > { %v2335_v36 = vmax.f32 %v2328_v4, %v519_v26  ;;  %v503_v12 = vpop.xlane.xlu2 %502  ;;  %v495_v13 = vpop.xlane.xlu0 %494 }
 0x180   : > { %v2338_v39 = vmax.f32 %v2330_v7, %v503_v12  ;;  %v2341_v62 = vmax.f32 %v2332_v22, %v495_v13  ;;  %v2357_v12 = vld [vmem:[#allocation2 + $0x10] sm:$0xff]  ;;  %v2359_v13 = vld [vmem:[#allocation2 + $0x48] sm:$0xff] }
 0x181   : > { %2927 = vst [vmem:[#allocation24_spill] sm:$0xff] %v2335_v36 }
 0x182   : > { %1118 = vst.msk [vmem:[#allocation2 + $0x68] sm:$0xff] %vm812_vm2, %v2335_v36  ;;  %646 = vperm.xlu1 %1675, %v2313_v31   ;;  %611 = vperm.xlu2 %1676, %v2341_v62  }
 0x183   : > { %1110 = vst.msk [vmem:[#allocation2 + $0x28] sm:$0xff] %vm812_vm2, %v2338_v39 }
 0x184   : > { %1106 = vst.msk [vmem:[#allocation2 + $0x8] sm:$0xff] %vm812_vm2, %v2341_v62 }
 0x185   : > { %2928 = vst [vmem:[#allocation25_spill] sm:$0xff] %v2357_v12 }
 0x186   : > { %2929 = vst [vmem:[#allocation26_spill] sm:$0xff] %v2359_v13  ;;  %v497_v1 = vpop.xlane.xlu1 %496 }
 0x187   : > { %v2364_v56 = vmax.f32 %v2357_v12, %v497_v1  ;;  %v511_v33 = vpop.xlane.xlu0 %510  ;;  %v521_v43 = vpop.xlane.xlu2 %520  ;;  %v2388_v1 = vld [vmem:[#allocation2 + $0x30] sm:$0xff] }
 0x188   : > { %v2367_v26 = vmax.f32 %v2359_v13, %v511_v33  ;;  %v2370_v53 = vmax.f32 %v2361_v59, %v521_v43  ;;  %v2386_v43 = vld [vmem:[#allocation2 + $0x50] sm:$0xff]  ;;  %2934 = vst [vmem:[#allocation31_spill] sm:$0xff] %v2388_v1 }
 0x189   : > { %1107 = vst.msk [vmem:[#allocation2 + $0x10] sm:$0xff] %vm812_vm2, %v2364_v56 }
 0x18a   : > { %2931 = vst [vmem:[#allocation28_spill] sm:$0xff] %v2367_v26  ;;  %631 = vperm.xlu2 %1676, %v2338_v39   ;;  %651 = vperm.xlu0 %1677, %v2367_v26  }
 0x18b   : > { %2932 = vst [vmem:[#allocation29_spill] sm:$0xff] %v2370_v53 }
 0x18c   : > { %1114 = vst.msk [vmem:[#allocation2 + $0x48] sm:$0xff] %vm812_vm2, %v2367_v26 }
 0x18d   : > { %1119 = vst.msk [vmem:[#allocation2 + $0x70] sm:$0xff] %vm812_vm2, %v2370_v53 }
 0x18e   : > { %2933 = vst [vmem:[#allocation30_spill] sm:$0xff] %v2386_v43  ;;  %v513_v4 = vpop.xlane.xlu1 %512 }
 0x18f   : > { %v2393_v12 = vmax.f32 %v2386_v43, %v513_v4  ;;  %v505_v51 = vpop.xlane.xlu0 %504  ;;  %v515_v32 = vpop.xlane.xlu2 %514  ;;  %v2418_v4 = vld [vmem:[#allocation2 + $0x78] sm:$0xff] }
 0x190   : > { %v2396_v26 = vmax.f32 %v2388_v1, %v505_v51  ;;  %v2399_v33 = vmax.f32 %v2390_v19, %v515_v32  ;;  %v2416_v51 = vld [vmem:[#allocation2 + $0x18] sm:$0xff]  ;;  %2939 = vst [vmem:[#allocation36_spill] sm:$0xff] %v2418_v4  ;;  %v863_v19 = vlaneseq }
 0x191   : > { %2936 = vst [vmem:[#allocation33_spill] sm:$0xff] %v2393_v12 }
 0x192   : > { %2937 = vst [vmem:[#allocation34_spill] sm:$0xff] %v2399_v33  ;;  %671 = vperm.xlu2 %1676, %v2335_v36   ;;  %616 = vperm.xlu0 %1677, %v2364_v56  }
 0x193   : > { %1115 = vst.msk [vmem:[#allocation2 + $0x50] sm:$0xff] %vm812_vm2, %v2393_v12  ;;  %636 = vperm.xlu1 %1675, %v2396_v26  }
 0x194   : > { %1111 = vst.msk [vmem:[#allocation2 + $0x30] sm:$0xff] %vm812_vm2, %v2396_v26 }
 0x195   : > { %1116 = vst.msk [vmem:[#allocation2 + $0x58] sm:$0xff] %vm812_vm2, %v2399_v33 }
 0x196   : > { %2938 = vst [vmem:[#allocation35_spill] sm:$0xff] %v2416_v51  ;;  %v499_v59 = vpop.xlane.xlu1 %498 }
 0x197   : > { %v2421_v13 = vmax.f32 %v2416_v51, %v499_v59  ;;  %v523_v43 = vpop.xlane.xlu0 %522  ;;  %v2437_v59 = vld [vmem:[#allocation2 + $0x38] sm:$0xff] }
 0x198   : > { %v2424_v1 = vmax.f32 %v2418_v4, %v523_v43  ;;  %2942 = vst [vmem:[#allocation39_spill] sm:$0xff] %v2437_v59 }
 0x199   : > { %2940 = vst [vmem:[#allocation37_spill] sm:$0xff] %v2421_v13 }
 0x19a   : > { %2941 = vst [vmem:[#allocation38_spill] sm:$0xff] %v2424_v1  ;;  %656 = vperm.xlu2 %1676, %v2393_v12   ;;  %681 = vperm.xlu0 %1677, %v2424_v1  }
 0x19b   : > { %1108 = vst.msk [vmem:[#allocation2 + $0x18] sm:$0xff] %vm812_vm2, %v2421_v13  ;;  %676 = vperm.xlu1 %1675, %v2370_v53  }
 0x19c   : > { %1120 = vst.msk [vmem:[#allocation2 + $0x78] sm:$0xff] %vm812_vm2, %v2424_v1  ;;  %v2449_v1 = vand.u32 127, %v863_v19 }
 0x19e   : > { %v507_v43 = vpop.xlane.xlu1 %506  ;;  %vm913_vm3 = vcmp.eq.s32.totalorder %v2449_v1, %v2261_v44  ;;  %vm917_vm4 = vcmp.eq.s32.totalorder %v2449_v1, %v2265_v46  ;;  %vm925_vm5 = vcmp.eq.s32.totalorder %v2449_v1, %v2285_v0  ;;  %vm921_vm6 = vcmp.eq.s32.totalorder %v2449_v1, %v2269_v48 }
 0x19f   : > { %v2440_v32 = vmax.f32 %v2437_v59, %v507_v43  ;;  %vm914_vm7 = vcmp.eq.s32.totalorder %v2449_v1, %v2257_v41  ;;  %vm922_vm8 = vcmp.eq.s32.totalorder %v2449_v1, %v2279_v58  ;;  %vm918_vm9 = vcmp.eq.s32.totalorder %v2449_v1, %v2263_v45 }
 0x1a0   : > { %vm919_vm10 = vcmp.eq.s32.totalorder %v2449_v1, %v2273_v52  ;;  %vm915_vm11 = vcmp.eq.s32.totalorder %v2449_v1, %v2259_v42  ;;  %vm923_vm12 = vcmp.eq.s32.totalorder %v2449_v1, %v2277_v55  ;;  %vm920_vm13 = vcmp.eq.s32.totalorder %v2449_v1, %v2271_v49 }
 0x1a1   : > { %1112 = vst.msk [vmem:[#allocation2 + $0x38] sm:$0xff] %vm812_vm2, %v2440_v32  ;;  %vm916_vm14 = vcmp.eq.s32.totalorder %v2449_v1, %v2267_v47  ;;  %vm924_vm15 = vcmp.eq.s32.totalorder %v2449_v1, %v2275_v54  ;;  %vm928_vm0 = vcmp.eq.s32.totalorder %v2449_v1, %v2310_v21  ;;  %vm927_vm1 = vcmp.eq.s32.totalorder %v2449_v1, %v2281_v60  ;;  %v977_v21 = vld [vmem:[#allocation4] sm:$0xff] }
 0x1a2   : > { %621 = vperm.xlu2 %1676, %v2421_v13  }
 0x1a3   : > { %661 = vperm.xlu1 %1675, %v2399_v33  }
 0x1aa   : > { %641 = vperm.xlu2 %1676, %v2440_v32  }
 0x1dc   : > { %v612_v43 = vpop.permute.xlu2 %611 }
 0x1e4   : > { %v607_v4 = vpop.permute.xlu1 %606 }
 0x1e5   : > { %v684_v12 = vsub.f32 %v2209_v5, %v607_v4  ;;  %v632_v4 = vpop.permute.xlu2 %631 }
 0x1e7   : > { %v993_v51 = vsel %vm913_vm3, %v684_v12, 0.0  ;;  %v700_v53 = vmul.f32 1.442695, %v684_v12  ;;  %vm926_vm3 = vcmp.eq.s32.totalorder %v2449_v1, %v2283_v61 }
 0x1e8   : > { %1009 = vadd.xlane.f32.xlu0 %v993_v51 }
 0x1e9   : > { %1679 = vpow2.f32 %v700_v53 }
 0x1ec   : > { %v627_v59 = vpop.permute.xlu1 %626  ;;  %v667_v36 = vpop.permute.xlu0 %666 }
 0x1ed   : > { %v688_v13 = vsub.f32 %v2211_v6, %v627_v59  ;;  %v696_v19 = vsub.f32 %v2215_v9, %v667_v36  ;;  %v672_v36 = vpop.permute.xlu2 %671  ;;  %v685_v59 = vsub.f32 %v2223_v16, %v612_v43 }
 0x1ee   : > { %v2477_v52 = vsub.f32 %v2221_v15, %v672_v36 }
 0x1ef   : > { %v997_v5 = vsel %vm917_vm4, %v688_v13, 0.0  ;;  %v724_v33 = vmul.f32 1.442695, %v696_v19  ;;  %v1005_v44 = vsel %vm925_vm5, %v696_v19, 0.0  ;;  %v708_v51 = vmul.f32 1.442695, %v688_v13  ;;  %v1680_v46 = vpop.eup %1679 }
 0x1f0   : > { %1017 = vadd.xlane.f32.xlu2 %v997_v5  ;;  %1033 = vadd.xlane.f32.xlu0 %v1005_v44  ;;  %v994_v48 = vsel %vm914_vm7, %v685_v59, 0.0  ;;  %v689_v5 = vsub.f32 %v2225_v17, %v632_v4  ;;  %v702_v16 = vmul.f32 1.442695, %v685_v59  ;;  %v1006_v54 = vsel %vm926_vm3, %v2477_v52, 0.0 }
 0x1f1   : > { %1681 = vpow2.f32 %v724_v33  ;;  %vm929_vm4 = vcmp.ge.s32.totalorder %v2122_v28, 0  ;;  %vm945_vm5 = vcmp.lt.s32.totalorder %v2122_v28, 128  ;;  %vm933_vm7 = vcmp.ge.s32.totalorder %v2129_v29, 0  ;;  %v981_v28 = vld [vmem:[#allocation4 + $0x20] sm:$0xff] }
 0x1f2   : > { %1683 = vpow2.f32 %v708_v51  ;;  %v710_v44 = vmul.f32 1.442695, %v689_v5  ;;  %v998_v51 = vsel %vm918_vm9, %v689_v5, 0.0  ;;  %vm941_vm9 = vcmp.ge.s32.totalorder %v2194_v63, 0 }
 0x1f3   : > { %vm938_vm3 = vcmp.ge.s32.totalorder %v2179_v57, 0 }
 0x1f4   : > { %v647_v12 = vpop.permute.xlu1 %646 }
 0x1f5   : > { %v692_v6 = vsub.f32 %v2217_v10, %v647_v12  ;;  %v657_v43 = vpop.permute.xlu2 %656 }
 0x1f6   : > { %v694_v59 = vsub.f32 %v2239_v27, %v657_v43 }
 0x1f7   : > { %v1001_v9 = vsel %vm921_vm6, %v692_v6, 0.0  ;;  %v1682_v0 = vpop.eup %1681  ;;  %v716_v19 = vmul.f32 1.442695, %v692_v6  ;;  %vm961_vm6 = vmand %vm929_vm4, %vm945_vm5  ;;  %vm954_vm4 = vcmp.lt.s32.totalorder %v2179_v57, 128 }
 0x1f8   : > { %764 = vadd.xlane.f32.xlu2 %v1680_v46  ;;  %1025 = vadd.xlane.f32.xlu1 %v1001_v9  ;;  %v1684_v10 = vpop.eup %1683 }
 0x1f9   : > { %788 = vadd.xlane.f32.xlu0 %v1682_v0  ;;  %1685 = vpow2.f32 %v716_v19 }
 0x1fa   : > { %1687 = vpow2.f32 %v702_v16 }
 0x1fb   : > { %1689 = vpow2.f32 %v710_v44 }
 0x1fc   : > { %v652_v53 = vpop.permute.xlu0 %651 }
 0x1fd   : > { %v693_v33 = vsub.f32 %v2234_v24, %v652_v53  ;;  %v622_v45 = vpop.permute.xlu2 %621  ;;  %v726_v53 = vmul.f32 1.442695, %v2477_v52  ;;  %v2944_v52 = vsub.f32 %v2308_v18, %v2316_v35 }
 0x1fe   : > { %v687_v44 = vsub.f32 %v2248_v37, %v622_v45 }
 0x1ff   : > { %v1002_v13 = vsel %vm922_vm8, %v693_v33, 0.0  ;;  %v1686_v41 = vpop.eup %1685  ;;  %v718_v58 = vmul.f32 1.442695, %v693_v33  ;;  %v1003_v33 = vsel %vm923_vm12, %v694_v59, 0.0  ;;  %vm949_vm8 = vcmp.lt.s32.totalorder %v2129_v29, 128 }
 0x200   : > { %1011 = vadd.xlane.f32.xlu2 %v994_v48  ;;  %772 = vadd.xlane.f32.xlu1 %v1684_v10  ;;  %v1688_v46 = vpop.eup %1687 }
 0x201   : > { %1027 = vadd.xlane.f32.xlu0 %v1002_v13  ;;  %1691 = vpow2.f32 %v718_v58  ;;  %v1690_v9 = vpop.eup %1689  ;;  %v720_v13 = vmul.f32 1.442695, %v694_v59  ;;  %v1057_v59 = vsel %vm961_vm6, %v2295_v11, 0.0  ;;  %vm970_vm6 = vmand %vm938_vm3, %vm954_vm4 }
 0x204   : > { %v617_v6 = vpop.permute.xlu0 %616 }
 0x205   : > { %v637_v12 = vpop.permute.xlu1 %636  ;;  %v686_v4 = vsub.f32 %v2230_v20, %v617_v6  ;;  %v642_v48 = vpop.permute.xlu2 %641 }
 0x206   : > { %v690_v24 = vsub.f32 %v2241_v30, %v637_v12  ;;  %v691_v36 = vsub.f32 %v2254_v40, %v642_v48  ;;  %v706_v40 = vmul.f32 1.442695, %v687_v44 }
 0x207   : > { %v704_v30 = vmul.f32 1.442695, %v686_v4  ;;  %v1692_v0 = vpop.eup %1691  ;;  %v995_v10 = vsel %vm915_vm11, %v686_v4, 0.0  ;;  %vm965_vm11 = vmand %vm933_vm7, %vm949_vm8 }
 0x208   : > { %780 = vadd.xlane.f32.xlu2 %v1686_v41  ;;  %1019 = vadd.xlane.f32.xlu1 %v998_v51  ;;  %v999_v17 = vsel %vm919_vm10, %v690_v24, 0.0  ;;  %v712_v19 = vmul.f32 1.442695, %v690_v24  ;;  %v1000_v5 = vsel %vm920_vm13, %v691_v36, 0.0  ;;  %v996_v51 = vsel %vm916_vm14, %v687_v44, 0.0 }
 0x209   : > { %1021 = vadd.xlane.f32.xlu0 %v999_v17  ;;  %1693 = vpow2.f32 %v704_v30  ;;  %v714_v37 = vmul.f32 1.442695, %v691_v36  ;;  %vm957_vm10 = vcmp.lt.s32.totalorder %v2194_v63, 128  ;;  %v1061_v29 = vsel %vm965_vm11, %v2292_v8, 0.0  ;;  %v732_v36 = vld [vmem:[#allocation3] sm:$0xff] }
 0x20a   : > { %1695 = vpow2.f32 %v726_v53  ;;  %v596_v53 = vmul.f32 1.442695, %v2944_v52  ;;  %vm973_vm12 = vmand %vm941_vm9, %vm957_vm10  ;;  %vm937_vm13 = vcmp.ge.s32.totalorder %v2157_v50, 0  ;;  %vm953_vm14 = vcmp.lt.s32.totalorder %v2157_v50, 128 }
 0x20b   : > { %1697 = vpow2.f32 %v712_v19  ;;  %v2945_v19 = vsub.f32 %v2287_v2, %v2292_v8  ;;  %v985_v2 = vld [vmem:[#allocation4 + $0x40] sm:$0xff]  ;;  %v2946_v44 = vsub.f32 %v2306_v14, %v2313_v31  ;;  %v978_v14 = vld [vmem:[#allocation4 + $0x8] sm:$0xff] }
 0x20c   : > { %1699 = vpow2.f32 %v720_v13  ;;  %v682_v16 = vpop.permute.xlu0 %681 }
 0x20d   : > { %v677_v20 = vpop.permute.xlu1 %676 }
 0x20e   : > { %v698_v27 = vsub.f32 %v2232_v23, %v677_v20  ;;  %v699_v23 = vsub.f32 %v2250_v38, %v682_v16 }
 0x20f   : > { %v1694_v15 = vpop.eup %1693 }
 0x210   : > { %774 = vadd.xlane.f32.xlu2 %v1690_v9  ;;  %766 = vadd.xlane.f32.xlu1 %v1688_v46  ;;  %v728_v42 = vmul.f32 1.442695, %v698_v27  ;;  %v1696_v55 = vpop.eup %1695  ;;  %v730_v58 = vmul.f32 1.442695, %v699_v23  ;;  %v1007_v45 = vsel %vm927_vm1, %v698_v27, 0.0  ;;  %vm946_vm1 = vcmp.lt.s32.totalorder %v2114_v25, 128 }
 0x211   : > { %782 = vadd.xlane.f32.xlu0 %v1692_v0  ;;  %v1698_v43 = vpop.eup %1697  ;;  %v2943_v0 = vsub.f32 %v2289_v3, %v2295_v11  ;;  %v989_v3 = vld [vmem:[#allocation4 + $0x60] sm:$0xff] }
 0x212   : > { %1701 = vpow2.f32 %v728_v42  ;;  %v1700_v12 = vpop.eup %1699  ;;  %v744_v42 = vld [vmem:[#allocation3 + $0x60] sm:$0xff] }
 0x213   : > { %1703 = vpow2.f32 %v706_v40  ;;  %v572_v60 = vmul.f32 1.442695, %v2943_v0 }
 0x214   : > { %1705 = vpow2.f32 %v730_v58  ;;  %v736_v58 = vld [vmem:[#allocation3 + $0x20] sm:$0xff] }
 0x215   : > { %v662_v24 = vpop.permute.xlu1 %661  ;;  %1707 = vpow2.f32 %v714_v37  ;;  %v986_v37 = vld [vmem:[#allocation4 + $0x48] sm:$0xff] }
 0x216   : > { %v695_v49 = vsub.f32 %v2243_v34, %v662_v24  ;;  %v1008_v34 = vsel %vm928_vm0, %v699_v23, 0.0  ;;  %v588_v23 = vmul.f32 1.442695, %v2946_v44  ;;  %vm930_vm0 = vcmp.ge.s32.totalorder %v2114_v25, 0 }
 0x217   : > { %vm962_vm5 = vmand %vm930_vm0, %vm946_vm1 }
 0x218   : > { %1029 = vadd.xlane.f32.xlu2 %v1003_v33  ;;  %1013 = vadd.xlane.f32.xlu1 %v995_v10  ;;  %v1702_v41 = vpop.eup %1701  ;;  %v722_v6 = vmul.f32 1.442695, %v695_v49  ;;  %v1004_v17 = vsel %vm924_vm15, %v695_v49, 0.0  ;;  %v580_v33 = vmul.f32 1.442695, %v2945_v19  ;;  %vm969_vm15 = vmand %vm937_vm13, %vm953_vm14 }
 0x219   : > { %768 = vadd.xlane.f32.xlu0 %v1694_v15  ;;  %v1704_v38 = vpop.eup %1703  ;;  %v1069_v15 = vsel %vm973_vm12, %v2316_v35, 0.0  ;;  %v1065_v50 = vsel %vm969_vm15, %v2313_v31, 0.0 }
 0x21a   : > { %v1706_v4 = vpop.eup %1705  ;;  %1709 = vpow2.f32 %v722_v6  ;;  %v2947_v6 = vsub.f32 %v2330_v7, %v2338_v39 }
 0x21b   : > { %v1708_v47 = vpop.eup %1707  ;;  %1711 = vpow2.f32 %v572_v60  ;;  %v740_v60 = vld [vmem:[#allocation3 + $0x40] sm:$0xff] }
 0x21c   : > { %1713 = vpow2.f32 %v596_v53  ;;  %v582_v25 = vmul.f32 1.442695, %v2947_v6 }
 0x21d   : > { %1715 = vpow2.f32 %v580_v33 }
 0x21e   : > { %1717 = vpow2.f32 %v588_v23 }
 0x21f   : > { %1719 = vpow2.f32 %v582_v25 }
 0x220   : > { %1023 = vadd.xlane.f32.xlu2 %v1000_v5  ;;  %790 = vadd.xlane.f32.xlu1 %v1696_v55  ;;  %v1710_v46 = vpop.eup %1709 }
 0x221   : > { %776 = vadd.xlane.f32.xlu0 %v1698_v43  ;;  %v1712_v63 = vpop.eup %1711 }
 0x222   : > { %v1714_v13 = vpop.eup %1713  ;;  %v748_v8 = vmul.f32 %v1712_v63, %v732_v36 }
 0x223   : > { %v760_v43 = vmul.f32 %v1714_v13, %v744_v42  ;;  %v737_v13 = vld [vmem:[#allocation3 + $0x28] sm:$0xff] }
 0x228   : > { %792 = vadd.xlane.f32.xlu2 %v1702_v41  ;;  %784 = vadd.xlane.f32.xlu1 %v1700_v12  ;;  %v1716_v41 = vpop.eup %1715 }
 0x229   : > { %1015 = vadd.xlane.f32.xlu0 %v996_v51  ;;  %v752_v31 = vmul.f32 %v1716_v41, %v736_v58  ;;  %v2959_v58 = vld [vmem:[#allocation13_spill] sm:$0xff] }
 0x22a   : > { %vm931_vm13 = vcmp.ge.s32.totalorder %v2959_v58, 0  ;;  %vm947_vm14 = vcmp.lt.s32.totalorder %v2959_v58, 128 }
 0x22b   : > { %vm2576_vm1 = vmand %vm931_vm13, %vm947_vm14 }
 0x230   : > { %770 = vadd.xlane.f32.xlu2 %v1704_v38  ;;  %1031 = vadd.xlane.f32.xlu1 %v1004_v17 }
 0x231   : > { %794 = vadd.xlane.f32.xlu0 %v1706_v4  ;;  %v2948_v4 = vsub.f32 %v2332_v22, %v2341_v62  ;;  %v982_v22 = vld [vmem:[#allocation4 + $0x28] sm:$0xff] }
 0x238   : > { %786 = vadd.xlane.f32.xlu2 %v1710_v46  ;;  %778 = vadd.xlane.f32.xlu1 %v1708_v47  ;;  %v574_v47 = vmul.f32 1.442695, %v2948_v4  ;;  %v1058_v46 = vsel %vm962_vm5, %v2341_v62, 0.0  ;;  %v734_v4 = vld [vmem:[#allocation3 + $0x10] sm:$0xff] }
 0x239   : > { %1039 = vadd.xlane.f32.xlu0 %v1008_v34 }
 0x23a   : > { %1721 = vpow2.f32 %v574_v47 }
 0x240   : > { %1035 = vadd.xlane.f32.xlu2 %v1006_v54  ;;  %1037 = vadd.xlane.f32.xlu1 %v1007_v45  ;;  %v1718_v45 = vpop.eup %1717 }
 0x241   : > { %v756_v52 = vmul.f32 %v1718_v45, %v740_v60  ;;  %v1720_v33 = vpop.eup %1719 }
 0x25b   : > { %v1010_v9 = vpop.xlane.xlu0 %1009 }
 0x25c   : > { %v1041_v30 = vadd.f32 %v1010_v9, %v977_v21  ;;  %v2949_v21 = vld [vmem:[#allocation26_spill] sm:$0xff]  ;;  %v2950_v9 = vld [vmem:[#allocation28_spill] sm:$0xff] }
 0x25d   : > { %v1066_v0 = vsel %vm970_vm6, %v2950_v9, 0.0 }
 0x25e   : > { %v1073_v61 = vadd.f32 %v1057_v59, %v1041_v30  ;;  %v2951_v30 = vsub.f32 %v2949_v21, %v2950_v9  ;;  %v2952_v59 = vld [vmem:[#allocation14_spill] sm:$0xff] }
 0x25f   : > { %vm934_vm7 = vcmp.ge.s32.totalorder %v2952_v59, 0  ;;  %vm950_vm8 = vcmp.lt.s32.totalorder %v2952_v59, 128 }
 0x260   : > { %1089 = vst.msk [vmem:[#allocation4] sm:$0xff] %vm812_vm2, %v1073_v61  ;;  %v590_v7 = vmul.f32 1.442695, %v2951_v30  ;;  %v2953_v61 = vld [vmem:[#allocation17_spill] sm:$0xff]  ;;  %vm966_vm11 = vmand %vm934_vm7, %vm950_vm8  ;;  %v2968_v30 = vld [vmem:[#allocation30_spill] sm:$0xff] }
 0x261   : > { %vm935_vm9 = vcmp.ge.s32.totalorder %v2953_v61, 0  ;;  %vm951_vm10 = vcmp.lt.s32.totalorder %v2953_v61, 128 }
 0x262   : > { %1723 = vpow2.f32 %v590_v7  ;;  %vm967_vm12 = vmand %vm935_vm9, %vm951_vm10  ;;  %v2969_v7 = vld [vmem:[#allocation33_spill] sm:$0xff] }
 0x263   : > { %v1018_v11 = vpop.xlane.xlu2 %1017  ;;  %v1034_v18 = vpop.xlane.xlu0 %1033  ;;  %v1063_v36 = vsel %vm967_vm12, %v2396_v26, 0.0 }
 0x264   : > { %v1045_v20 = vadd.f32 %v1018_v11, %v981_v28  ;;  %v1053_v10 = vadd.f32 %v1034_v18, %v989_v3  ;;  %v983_v3 = vld [vmem:[#allocation4 + $0x30] sm:$0xff]  ;;  %v1062_v18 = vsel %vm966_vm11, %v2338_v39, 0.0  ;;  %v741_v39 = vld [vmem:[#allocation3 + $0x48] sm:$0xff] }
 0x266   : > { %v1077_v48 = vadd.f32 %v1061_v29, %v1045_v20  ;;  %v1085_v27 = vadd.f32 %v1069_v15, %v1053_v10  ;;  %v2954_v15 = vld [vmem:[#allocation25_spill] sm:$0xff] }
 0x267   : > { %v2955_v63 = vsub.f32 %v2954_v15, %v2364_v56 }
 0x268   : > { %1093 = vst.msk [vmem:[#allocation4 + $0x20] sm:$0xff] %vm812_vm2, %v1077_v48  ;;  %v1722_v48 = vpop.eup %1721 }
 0x269   : > { %1101 = vst.msk [vmem:[#allocation4 + $0x60] sm:$0xff] %vm812_vm2, %v1085_v27  ;;  %v576_v27 = vmul.f32 1.442695, %v2955_v63  ;;  %v2972_v63 = vld [vmem:[#allocation35_spill] sm:$0xff] }
 0x26b   : > { %v765_v55 = vpop.xlane.xlu2 %764  ;;  %v1026_v5 = vpop.xlane.xlu1 %1025  ;;  %1725 = vpow2.f32 %v576_v27  ;;  %v2973_v27 = vld [vmem:[#allocation37_spill] sm:$0xff] }
 0x26c   : > { %v796_v35 = vadd.f32 %v765_v55, %v748_v8  ;;  %v1049_v16 = vadd.f32 %v1026_v5, %v985_v2  ;;  %v789_v40 = vpop.xlane.xlu0 %788  ;;  %v733_v2 = vld [vmem:[#allocation3 + $0x8] sm:$0xff]  ;;  %v1724_v8 = vpop.eup %1723  ;;  %v753_v55 = vmul.f32 %v1720_v33, %v737_v13 }
 0x26d   : > { %v808_v24 = vadd.f32 %v789_v40, %v760_v43  ;;  %v749_v5 = vmul.f32 %v1722_v48, %v733_v2  ;;  %v757_v23 = vmul.f32 %v1724_v8, %v741_v39  ;;  %v2957_v40 = vld [vmem:[#allocation24_spill] sm:$0xff] }
 0x26e   : > { %813 = vst.msk [vmem:[#allocation3] sm:$0xff] %vm812_vm2, %v796_v35  ;;  %v1081_v12 = vadd.f32 %v1065_v50, %v1049_v16  ;;  %v2956_v50 = vld [vmem:[#allocation23_spill] sm:$0xff] }
 0x26f   : > { %825 = vst.msk [vmem:[#allocation3 + $0x60] sm:$0xff] %vm812_vm2, %v808_v24 }
 0x270   : > { %1097 = vst.msk [vmem:[#allocation4 + $0x40] sm:$0xff] %vm812_vm2, %v1081_v12  ;;  %v2958_v12 = vsub.f32 %v2956_v50, %v2957_v40  ;;  %v742_v50 = vld [vmem:[#allocation3 + $0x50] sm:$0xff] }
 0x271   : > { %v1726_v25 = vpop.eup %1725 }
 0x272   : > { %v598_v24 = vmul.f32 1.442695, %v2958_v12  ;;  %v750_v9 = vmul.f32 %v1726_v25, %v734_v4  ;;  %v2978_v12 = vld [vmem:[#allocation15_spill] sm:$0xff] }
 0x273   : > { %v1012_v49 = vpop.xlane.xlu2 %1011  ;;  %v773_v51 = vpop.xlane.xlu1 %772  ;;  %vm932_vm7 = vcmp.ge.s32.totalorder %v2978_v12, 0  ;;  %vm948_vm8 = vcmp.lt.s32.totalorder %v2978_v12, 128 }
 0x274   : > { %v1042_v38 = vadd.f32 %v1012_v49, %v978_v14  ;;  %v800_v17 = vadd.f32 %v773_v51, %v752_v31  ;;  %v1028_v34 = vpop.xlane.xlu0 %1027  ;;  %v2960_v31 = vld [vmem:[#allocation31_spill] sm:$0xff]  ;;  %1727 = vpow2.f32 %v598_v24  ;;  %vm964_vm9 = vmand %vm932_vm7, %vm948_vm8 }
 0x275   : > { %v1050_v54 = vadd.f32 %v1028_v34, %v986_v37  ;;  %v2961_v49 = vsub.f32 %v2960_v31, %v2396_v26  ;;  %v2962_v37 = vld [vmem:[#allocation18_spill] sm:$0xff]  ;;  %v2966_v34 = vld [vmem:[#allocation29_spill] sm:$0xff]  ;;  %v980_v31 = vld [vmem:[#allocation4 + $0x18] sm:$0xff] }
 0x276   : > { %v1074_v57 = vadd.f32 %v1058_v46, %v1042_v38  ;;  %817 = vst.msk [vmem:[#allocation3 + $0x20] sm:$0xff] %vm812_vm2, %v800_v17  ;;  %vm939_vm15 = vcmp.ge.s32.totalorder %v2962_v37, 0  ;;  %vm955_vm0 = vcmp.lt.s32.totalorder %v2962_v37, 128  ;;  %v987_v38 = vld [vmem:[#allocation4 + $0x50] sm:$0xff] }
 0x277   : > { %v1082_v62 = vadd.f32 %v1066_v0, %v1050_v54  ;;  %v584_v51 = vmul.f32 1.442695, %v2961_v49  ;;  %v979_v17 = vld [vmem:[#allocation4 + $0x10] sm:$0xff]  ;;  %vm971_vm3 = vmand %vm939_vm15, %vm955_vm0  ;;  %v2970_v0 = vsub.f32 %v2968_v30, %v2969_v7  ;;  %v2979_v49 = vld [vmem:[#allocation32_spill] sm:$0xff] }
 0x278   : > { %1090 = vst.msk [vmem:[#allocation4 + $0x8] sm:$0xff] %vm812_vm2, %v1074_v57  ;;  %v2965_v46 = vld [vmem:[#allocation27_spill] sm:$0xff]  ;;  %v1067_v59 = vsel %vm971_vm3, %v2969_v7, 0.0 }
 0x279   : > { %1098 = vst.msk [vmem:[#allocation4 + $0x48] sm:$0xff] %vm812_vm2, %v1082_v62  ;;  %1729 = vpow2.f32 %v584_v51  ;;  %v2967_v57 = vsub.f32 %v2965_v46, %v2966_v34  ;;  %v592_v60 = vmul.f32 1.442695, %v2970_v0  ;;  %v1059_v62 = vsel %vm2576_vm1, %v2364_v56, 0.0  ;;  %v2980_v51 = vld [vmem:[#allocation34_spill] sm:$0xff]  ;;  %v747_v7 = vld [vmem:[#allocation3 + $0x78] sm:$0xff] }
 0x27a   : > { %v2981_v37 = vsub.f32 %v2979_v49, %v2980_v51 }
 0x27b   : > { %v781_v53 = vpop.xlane.xlu2 %780  ;;  %v1020_v28 = vpop.xlane.xlu1 %1019  ;;  %v600_v54 = vmul.f32 1.442695, %v2967_v57 }
 0x27c   : > { %v804_v11 = vadd.f32 %v781_v53, %v756_v52  ;;  %v1046_v20 = vadd.f32 %v1020_v28, %v982_v22  ;;  %v1022_v19 = vpop.xlane.xlu0 %1021  ;;  %v1728_v28 = vpop.eup %1727  ;;  %v594_v6 = vmul.f32 1.442695, %v2981_v37 }
 0x27d   : > { %v1047_v10 = vadd.f32 %v1022_v19, %v983_v3  ;;  %v2971_v3 = vld [vmem:[#allocation16_spill] sm:$0xff]  ;;  %1731 = vpow2.f32 %v600_v54  ;;  %v738_v19 = vld [vmem:[#allocation3 + $0x30] sm:$0xff]  ;;  %v1060_v54 = vsel %vm964_vm9, %v2973_v27, 0.0 }
 0x27e   : > { %821 = vst.msk [vmem:[#allocation3 + $0x40] sm:$0xff] %vm812_vm2, %v804_v11  ;;  %v1078_v29 = vadd.f32 %v1062_v18, %v1046_v20  ;;  %vm936_vm4 = vcmp.ge.s32.totalorder %v2971_v3, 0  ;;  %vm952_vm5 = vcmp.lt.s32.totalorder %v2971_v3, 128  ;;  %v745_v11 = vld [vmem:[#allocation3 + $0x68] sm:$0xff]  ;;  %1733 = vpow2.f32 %v592_v60  ;;  %v984_v18 = vld [vmem:[#allocation4 + $0x38] sm:$0xff] }
 0x27f   : > { %v1079_v42 = vadd.f32 %v1063_v36, %v1047_v10  ;;  %v1730_v20 = vpop.eup %1729  ;;  %vm968_vm6 = vmand %vm936_vm4, %vm952_vm5  ;;  %v761_v56 = vmul.f32 %v1728_v28, %v745_v11  ;;  %v2974_v36 = vsub.f32 %v2972_v63, %v2973_v27 }
 0x280   : > { %1094 = vst.msk [vmem:[#allocation4 + $0x28] sm:$0xff] %vm812_vm2, %v1078_v29  ;;  %v754_v15 = vmul.f32 %v1730_v20, %v738_v19  ;;  %v1064_v2 = vsel %vm968_vm6, %v2440_v32, 0.0  ;;  %v739_v19 = vld [vmem:[#allocation3 + $0x38] sm:$0xff] }
 0x281   : > { %1095 = vst.msk [vmem:[#allocation4 + $0x30] sm:$0xff] %vm812_vm2, %v1079_v42  ;;  %v578_v13 = vmul.f32 1.442695, %v2974_v36 }
 0x283   : > { %v775_v35 = vpop.xlane.xlu2 %774  ;;  %v767_v16 = vpop.xlane.xlu1 %766  ;;  %1735 = vpow2.f32 %v578_v13 }
 0x284   : > { %v801_v43 = vadd.f32 %v775_v35, %v753_v55  ;;  %v797_v44 = vadd.f32 %v767_v16, %v749_v5  ;;  %v783_v41 = vpop.xlane.xlu0 %782  ;;  %v1732_v8 = vpop.eup %1731  ;;  %v2975_v35 = vld [vmem:[#allocation36_spill] sm:$0xff]  ;;  %v2976_v16 = vld [vmem:[#allocation38_spill] sm:$0xff] }
 0x285   : > { %v805_v14 = vadd.f32 %v783_v41, %v757_v23  ;;  %v1734_v5 = vpop.eup %1733  ;;  %v746_v23 = vld [vmem:[#allocation3 + $0x70] sm:$0xff] }
 0x286   : > { %818 = vst.msk [vmem:[#allocation3 + $0x28] sm:$0xff] %vm812_vm2, %v801_v43  ;;  %v2977_v43 = vsub.f32 %v2975_v35, %v2976_v16  ;;  %v762_v24 = vmul.f32 %v1732_v8, %v746_v23  ;;  %v758_v41 = vmul.f32 %v1734_v5, %v742_v50  ;;  %v2987_v8 = vld [vmem:[#allocation21_spill] sm:$0xff]  ;;  %v991_v5 = vld [vmem:[#allocation4 + $0x70] sm:$0xff] }
 0x287   : > { %814 = vst.msk [vmem:[#allocation3 + $0x8] sm:$0xff] %vm812_vm2, %v797_v44  ;;  %vm943_vm3 = vcmp.ge.s32.totalorder %v2987_v8, 0  ;;  %vm959_vm4 = vcmp.lt.s32.totalorder %v2987_v8, 128 }
 0x288   : > { %822 = vst.msk [vmem:[#allocation3 + $0x48] sm:$0xff] %vm812_vm2, %v805_v14  ;;  %v602_v44 = vmul.f32 1.442695, %v2977_v43  ;;  %vm975_vm6 = vmand %vm943_vm3, %vm959_vm4 }
 0x289   : > { %v1736_v57 = vpop.eup %1735  ;;  %v1071_v12 = vsel %vm975_vm6, %v2966_v34, 0.0 }
 0x28a   : > { %1737 = vpow2.f32 %v602_v44 }
 0x28b   : > { %v1030_v26 = vpop.xlane.xlu2 %1029  ;;  %v1014_v47 = vpop.xlane.xlu1 %1013  ;;  %1739 = vpow2.f32 %v594_v6 }
 0x28c   : > { %v1051_v45 = vadd.f32 %v1030_v26, %v987_v38  ;;  %v1043_v21 = vadd.f32 %v1014_v47, %v979_v17  ;;  %v769_v22 = vpop.xlane.xlu0 %768  ;;  %v2982_v17 = vld [vmem:[#allocation39_spill] sm:$0xff] }
 0x28d   : > { %v798_v53 = vadd.f32 %v769_v22, %v750_v9  ;;  %v2983_v4 = vsub.f32 %v2982_v17, %v2440_v32  ;;  %v988_v32 = vld [vmem:[#allocation4 + $0x58] sm:$0xff] }
 0x28e   : > { %v1083_v61 = vadd.f32 %v1067_v59, %v1051_v45  ;;  %v1075_v52 = vadd.f32 %v1059_v62, %v1043_v21  ;;  %v735_v45 = vld [vmem:[#allocation3 + $0x18] sm:$0xff] }
 0x28f   : > { %815 = vst.msk [vmem:[#allocation3 + $0x10] sm:$0xff] %vm812_vm2, %v798_v53  ;;  %v586_v26 = vmul.f32 1.442695, %v2983_v4  ;;  %v2984_v21 = vld [vmem:[#allocation19_spill] sm:$0xff]  ;;  %v751_v0 = vmul.f32 %v1736_v57, %v735_v45 }
 0x290   : > { %1099 = vst.msk [vmem:[#allocation4 + $0x50] sm:$0xff] %vm812_vm2, %v1083_v61  ;;  %vm940_vm10 = vcmp.ge.s32.totalorder %v2984_v21, 0  ;;  %vm956_vm11 = vcmp.lt.s32.totalorder %v2984_v21, 128  ;;  %v1738_v30 = vpop.eup %1737 }
 0x291   : > { %1091 = vst.msk [vmem:[#allocation4 + $0x10] sm:$0xff] %vm812_vm2, %v1075_v52  ;;  %1741 = vpow2.f32 %v586_v26  ;;  %vm972_vm12 = vmand %vm940_vm10, %vm956_vm11  ;;  %v763_v61 = vmul.f32 %v1738_v30, %v747_v7  ;;  %v1740_v28 = vpop.eup %1739 }
 0x292   : > { %v1068_v52 = vsel %vm972_vm12, %v2980_v51, 0.0 }
 0x293   : > { %v1024_v33 = vpop.xlane.xlu2 %1023  ;;  %v791_v29 = vpop.xlane.xlu1 %790 }
 0x294   : > { %v1048_v10 = vadd.f32 %v1024_v33, %v984_v18  ;;  %v809_v48 = vadd.f32 %v791_v29, %v761_v56  ;;  %v777_v42 = vpop.xlane.xlu0 %776  ;;  %v743_v18 = vld [vmem:[#allocation3 + $0x58] sm:$0xff]  ;;  %v2985_v56 = vld [vmem:[#allocation22_spill] sm:$0xff] }
 0x295   : > { %v802_v55 = vadd.f32 %v777_v42, %v754_v15  ;;  %vm944_vm13 = vcmp.ge.s32.totalorder %v2985_v56, 0  ;;  %vm960_vm14 = vcmp.lt.s32.totalorder %v2985_v56, 128  ;;  %v759_v33 = vmul.f32 %v1740_v28, %v743_v18  ;;  %v992_v15 = vld [vmem:[#allocation4 + $0x78] sm:$0xff] }
 0x296   : > { %v1080_v39 = vadd.f32 %v1064_v2, %v1048_v10  ;;  %826 = vst.msk [vmem:[#allocation3 + $0x68] sm:$0xff] %vm812_vm2, %v809_v48  ;;  %vm976_vm15 = vmand %vm944_vm13, %vm960_vm14  ;;  %v2986_v2 = vld [vmem:[#allocation20_spill] sm:$0xff] }
 0x297   : > { %819 = vst.msk [vmem:[#allocation3 + $0x30] sm:$0xff] %vm812_vm2, %v802_v55  ;;  %v1742_v20 = vpop.eup %1741  ;;  %vm942_vm0 = vcmp.ge.s32.totalorder %v2986_v2, 0  ;;  %vm958_vm1 = vcmp.lt.s32.totalorder %v2986_v2, 128  ;;  %v1072_v42 = vsel %vm976_vm15, %v2976_v16, 0.0  ;;  %v990_v55 = vld [vmem:[#allocation4 + $0x68] sm:$0xff] }
 0x298   : > { %1096 = vst.msk [vmem:[#allocation4 + $0x38] sm:$0xff] %vm812_vm2, %v1080_v39  ;;  %v755_v29 = vmul.f32 %v1742_v20, %v739_v19  ;;  %vm974_vm5 = vmand %vm942_vm0, %vm958_vm1 }
 0x299   : > { %v1070_v50 = vsel %vm974_vm5, %v2957_v40, 0.0 }
 0x29b   : > { %v793_v58 = vpop.xlane.xlu2 %792  ;;  %v785_v14 = vpop.xlane.xlu1 %784 }
 0x29c   : > { %v810_v25 = vadd.f32 %v793_v58, %v762_v24  ;;  %v806_v38 = vadd.f32 %v785_v14, %v758_v41  ;;  %v1016_v47 = vpop.xlane.xlu0 %1015 }
 0x29d   : > { %v1044_v46 = vadd.f32 %v1016_v47, %v980_v31 }
 0x29e   : > { %827 = vst.msk [vmem:[#allocation3 + $0x70] sm:$0xff] %vm812_vm2, %v810_v25 }
 0x29f   : > { %823 = vst.msk [vmem:[#allocation3 + $0x50] sm:$0xff] %vm812_vm2, %v806_v38  ;;  %v1076_v9 = vadd.f32 %v1060_v54, %v1044_v46 }
 0x2a1   : > { %1092 = vst.msk [vmem:[#allocation4 + $0x18] sm:$0xff] %vm812_vm2, %v1076_v9 }
 0x2a3   : > { %v771_v60 = vpop.xlane.xlu2 %770  ;;  %v1032_v59 = vpop.xlane.xlu1 %1031 }
 0x2a4   : > { %v799_v62 = vadd.f32 %v771_v60, %v751_v0  ;;  %v1052_v22 = vadd.f32 %v1032_v59, %v988_v32  ;;  %v795_v53 = vpop.xlane.xlu0 %794 }
 0x2a5   : > { %v811_v11 = vadd.f32 %v795_v53, %v763_v61 }
 0x2a6   : > { %816 = vst.msk [vmem:[#allocation3 + $0x18] sm:$0xff] %vm812_vm2, %v799_v62  ;;  %v1084_v3 = vadd.f32 %v1068_v52, %v1052_v22 }
 0x2a7   : > { %828 = vst.msk [vmem:[#allocation3 + $0x78] sm:$0xff] %vm812_vm2, %v811_v11 }
 0x2a8   : > { %1100 = vst.msk [vmem:[#allocation4 + $0x58] sm:$0xff] %vm812_vm2, %v1084_v3 }
 0x2ab   : > { %v787_v10 = vpop.xlane.xlu2 %786  ;;  %v779_v48 = vpop.xlane.xlu1 %778 }
 0x2ac   : > { %v807_v63 = vadd.f32 %v787_v10, %v759_v33  ;;  %v803_v27 = vadd.f32 %v779_v48, %v755_v29  ;;  %v1040_v36 = vpop.xlane.xlu0 %1039 }
 0x2ad   : > { %v1056_v13 = vadd.f32 %v1040_v36, %v992_v15 }
 0x2ae   : > { %824 = vst.msk [vmem:[#allocation3 + $0x58] sm:$0xff] %vm812_vm2, %v807_v63 }
 0x2af   : > { %820 = vst.msk [vmem:[#allocation3 + $0x38] sm:$0xff] %vm812_vm2, %v803_v27  ;;  %v1088_v39 = vadd.f32 %v1072_v42, %v1056_v13 }
 0x2b1   : > { %1104 = vst.msk [vmem:[#allocation4 + $0x78] sm:$0xff] %vm812_vm2, %v1088_v39 }
 0x2b3   : > { %v1036_v35 = vpop.xlane.xlu2 %1035  ;;  %v1038_v43 = vpop.xlane.xlu1 %1037 }
 0x2b4   : > { %v1054_v44 = vadd.f32 %v1036_v35, %v990_v55  ;;  %v1055_v23 = vadd.f32 %v1038_v43, %v991_v5 }
 0x2b5   : > { %1124 = sbr.rel (%p1553_p6) target bundleno = 942 (0x3ae), region = 85 }
 0x2b6   : > { %v1086_v16 = vadd.f32 %v1070_v50, %v1054_v44  ;;  %v1087_v24 = vadd.f32 %v1071_v12, %v1055_v23 }
 0x2b8   : > { %1102 = vst.msk [vmem:[#allocation4 + $0x68] sm:$0xff] %vm812_vm2, %v1086_v16 }
 0x2b9   : > { %1103 = vst.msk [vmem:[#allocation4 + $0x70] sm:$0xff] %vm812_vm2, %v1087_v24 }
 0x2ba   : > { %v1141_v41 = vld [vmem:[#allocation3] sm:$0xff]  ;;  %v1142_v58 = vld [vmem:[#allocation3 + $0x8] sm:$0xff]  ;;  %v1143_v14 = vld [vmem:[#allocation3 + $0x10] sm:$0xff] }
 0x2bb   : > { %1743 = vlog2.f32 %v1141_v41  ;;  %v1144_v31 = vld [vmem:[#allocation3 + $0x18] sm:$0xff]  ;;  %v1145_v49 = vld [vmem:[#allocation3 + $0x20] sm:$0xff]  ;;  %v1146_v40 = vld [vmem:[#allocation3 + $0x28] sm:$0xff] }
 0x2bc   : > { %1745 = vlog2.f32 %v1142_v58  ;;  %v1147_v37 = vld [vmem:[#allocation3 + $0x30] sm:$0xff]  ;;  %v1148_v25 = vld [vmem:[#allocation3 + $0x38] sm:$0xff]  ;;  %v1149_v17 = vld [vmem:[#allocation3 + $0x40] sm:$0xff] }
 0x2bd   : > { %1747 = vlog2.f32 %v1143_v14  ;;  %v1125_v26 = vld [vmem:[#allocation2] sm:$0xff]  ;;  %v1126_v54 = vld [vmem:[#allocation2 + $0x8] sm:$0xff]  ;;  %v1127_v45 = vld [vmem:[#allocation2 + $0x10] sm:$0xff] }
 0x2be   : > { %1749 = vlog2.f32 %v1144_v31  ;;  %v1150_v21 = vld [vmem:[#allocation3 + $0x48] sm:$0xff]  ;;  %v1128_v9 = vld [vmem:[#allocation2 + $0x18] sm:$0xff]  ;;  %v1151_v30 = vld [vmem:[#allocation3 + $0x50] sm:$0xff] }
 0x2bf   : > { %1751 = vlog2.f32 %v1145_v49  ;;  %v1129_v0 = vld [vmem:[#allocation2 + $0x20] sm:$0xff]  ;;  %v1152_v60 = vld [vmem:[#allocation3 + $0x58] sm:$0xff]  ;;  %v2642_v28 = vld [vmem:[%s2037_s28 + $0x8] sm:$0xff] }
 0x2c0   : > { %1753 = vlog2.f32 %v1146_v40  ;;  %v1153_v59 = vld [vmem:[#allocation3 + $0x60] sm:$0xff]  ;;  %v2645_v3 = vld [vmem:[%s2037_s28 + $0x10] sm:$0xff]  ;;  %v1130_v18 = vld [vmem:[#allocation2 + $0x28] sm:$0xff]  ;;  %vm1222_vm8 = vcmp.ne.s32.totalorder %v2642_v28, 4294967295 }
 0x2c1   : > { %v1744_v34 = vpop.eup %1743  ;;  %1755 = vlog2.f32 %v1147_v37  ;;  %v2639_v22 = vld [vmem:[%s2037_s28] sm:$0xff]  ;;  %v1238_v19 = vld [vmem:[#allocation4 + $0x8] sm:$0xff]  ;;  %v1239_v56 = vld [vmem:[#allocation4 + $0x10] sm:$0xff]  ;;  %vm1223_vm9 = vcmp.ne.s32.totalorder %v2645_v3, 4294967295 }
 0x2c2   : > { %v1746_v51 = vpop.eup %1745  ;;  %v1158_v4 = vmul.f32 0.6931472, %v1744_v34  ;;  %1757 = vlog2.f32 %v1148_v25  ;;  %v1237_v11 = vld [vmem:[#allocation4] sm:$0xff]  ;;  %v1154_v29 = vld [vmem:[#allocation3 + $0x68] sm:$0xff]  ;;  %v2648_v15 = vld [vmem:[%s2037_s28 + $0x18] sm:$0xff]  ;;  %vm1221_vm7 = vcmp.ne.s32.totalorder %v2639_v22, 4294967295 }
 0x2c3   : > { %v1748_v6 = vpop.eup %1747  ;;  %v1160_v47 = vmul.f32 0.6931472, %v1746_v51  ;;  %1759 = vlog2.f32 %v1149_v17  ;;  %v2651_v63 = vld [vmem:[%s2037_s28 + $0x20] sm:$0xff]  ;;  %v1155_v27 = vld [vmem:[#allocation3 + $0x70] sm:$0xff]  ;;  %v2655_v36 = vld [vmem:[%s2037_s28 + $0x28] sm:$0xff]  ;;  %vm1224_vm10 = vcmp.ne.s32.totalorder %v2648_v15, 4294967295 }
 0x2c4   : > { %v1750_v38 = vpop.eup %1749  ;;  %v1162_v46 = vmul.f32 0.6931472, %v1748_v6  ;;  %v1189_v62 = vadd.f32 %v1158_v4, %v1125_v26  ;;  %1761 = vlog2.f32 %v1150_v21  ;;  %v1240_v13 = vld [vmem:[#allocation4 + $0x18] sm:$0xff]  ;;  %v2660_v55 = vld [vmem:[%s2037_s28 + $0x30] sm:$0xff]  ;;  %vm1225_vm11 = vcmp.ne.s32.totalorder %v2651_v63, 4294967295  ;;  %v1241_v50 = vld [vmem:[#allocation4 + $0x20] sm:$0xff] }
 0x2c5   : > { %v1752_v57 = vpop.eup %1751  ;;  %v1164_v32 = vmul.f32 0.6931472, %v1750_v38  ;;  %v1190_v52 = vadd.f32 %v1160_v47, %v1126_v54  ;;  %1763 = vlog2.f32 %v1151_v30  ;;  %v2663_v5 = vld [vmem:[%s2037_s28 + $0x38] sm:$0xff]  ;;  %v1131_v44 = vld [vmem:[#allocation2 + $0x30] sm:$0xff]  ;;  %v2668_v58 = vld [vmem:[%s2037_s28 + $0x40] sm:$0xff]  ;;  %vm1226_vm12 = vcmp.ne.s32.totalorder %v2655_v36, 4294967295 }
 0x2c6   : > { %v1754_v7 = vpop.eup %1753  ;;  %v1166_v61 = vmul.f32 0.6931472, %v1752_v57  ;;  %v1191_v53 = vadd.f32 %v1162_v46, %v1127_v45  ;;  %1765 = vlog2.f32 %v1152_v60  ;;  %v1253_v2 = vsub.f32 %v1189_v62, %v1237_v11  ;;  %v1132_v16 = vld [vmem:[#allocation2 + $0x38] sm:$0xff]  ;;  %v1242_v40 = vld [vmem:[#allocation4 + $0x28] sm:$0xff]  ;;  %v1133_v26 = vld [vmem:[#allocation2 + $0x40] sm:$0xff] }
 0x2c7   : > { %v1756_v20 = vpop.eup %1755  ;;  %v1168_v10 = vmul.f32 0.6931472, %v1754_v7  ;;  %v1192_v48 = vadd.f32 %v1164_v32, %v1128_v9  ;;  %1767 = vlog2.f32 %v1153_v59  ;;  %v1254_v35 = vsub.f32 %v1190_v52, %v1238_v19  ;;  %v1156_v24 = vld [vmem:[#allocation3 + $0x78] sm:$0xff]  ;;  %v2676_v6 = vld [vmem:[%s2037_s28 + $0x48] sm:$0xff]  ;;  %v1243_v54 = vld [vmem:[#allocation4 + $0x30] sm:$0xff] }
 0x2c8   : > { %v1758_v33 = vpop.eup %1757  ;;  %v1170_v8 = vmul.f32 0.6931472, %v1756_v20  ;;  %v1193_v39 = vadd.f32 %v1166_v61, %v1129_v0  ;;  %v1255_v43 = vsub.f32 %v1191_v53, %v1239_v56  ;;  %1769 = vlog2.f32 %v1154_v29  ;;  %v1134_v47 = vld [vmem:[#allocation2 + $0x48] sm:$0xff]  ;;  %v1135_v45 = vld [vmem:[#allocation2 + $0x50] sm:$0xff]  ;;  %v1244_v59 = vld [vmem:[#allocation4 + $0x38] sm:$0xff] }
 0x2c9   : > { %v1760_v42 = vpop.eup %1759  ;;  %v1172_v23 = vmul.f32 0.6931472, %v1758_v33  ;;  %1771 = vlog2.f32 %v1155_v27  ;;  %v1194_v41 = vadd.f32 %v1168_v10, %v1130_v18  ;;  %v1256_v14 = vsub.f32 %v1192_v48, %v1240_v13  ;;  %v2684_v9 = vld [vmem:[%s2037_s28 + $0x50] sm:$0xff]  ;;  %v1136_v53 = vld [vmem:[#allocation2 + $0x58] sm:$0xff]  ;;  %v1245_v10 = vld [vmem:[#allocation4 + $0x40] sm:$0xff] }
 0x2ca   : > { %v1762_v12 = vpop.eup %1761  ;;  %v1174_v49 = vmul.f32 0.6931472, %v1760_v42  ;;  %vm1227_vm13 = vcmp.ne.s32.totalorder %v2660_v55, 4294967295  ;;  %vm1228_vm14 = vcmp.ne.s32.totalorder %v2663_v5, 4294967295  ;;  %v1269_v34 = vsel %vm1221_vm7, %v1253_v2, 0.0  ;;  %v2693_v20 = vld [vmem:[%s2037_s28 + $0x58] sm:$0xff] }
 0x2cb   : > { %v1764_v31 = vpop.eup %1763  ;;  %v1195_v37 = vadd.f32 %v1170_v8, %v1131_v44  ;;  %v1257_v25 = vsub.f32 %v1193_v39, %v1241_v50  ;;  %v1270_v38 = vsel %vm1222_vm8, %v1254_v35, 0.0  ;;  %v1271_v17 = vsel %vm1223_vm9, %v1255_v43, 0.0  ;;  %v1137_v27 = vld [vmem:[#allocation2 + $0x60] sm:$0xff]  ;;  %v1246_v50 = vld [vmem:[#allocation4 + $0x48] sm:$0xff]  ;;  %v1220_v55 = vld [vmem:[%s2037_s28 + $0x78] sm:$0xff] }
 0x2cc   : > { %v1766_v51 = vpop.eup %1765  ;;  %v1176_v46 = vmul.f32 0.6931472, %v1762_v12  ;;  %1773 = vlog2.f32 %v1156_v24  ;;  %v1196_v57 = vadd.f32 %v1172_v23, %v1132_v16  ;;  %vm1229_vm15 = vcmp.ne.s32.totalorder %v2668_v58, 4294967295  ;;  %v2700_v2 = vld [vmem:[%s2037_s28 + $0x60] sm:$0xff]  ;;  %v1247_v16 = vld [vmem:[#allocation4 + $0x50] sm:$0xff] }
 0x2cd   : > { %v1768_v4 = vpop.eup %1767  ;;  %v1178_v21 = vmul.f32 0.6931472, %v1764_v31  ;;  %v1258_v30 = vsub.f32 %v1194_v41, %v1242_v40  ;;  %v1272_v32 = vsel %vm1224_vm10, %v1256_v14, 0.0  ;;  %v1285_v7 = vsel %vm812_vm2, %v1269_v34, 0.0 }
 0x2ce   : > { %v1770_v0 = vpop.eup %1769  ;;  %v1180_v60 = vmul.f32 0.6931472, %v1766_v51  ;;  %vm1230_vm0 = vcmp.ne.s32.totalorder %v2676_v6, 4294967295  ;;  %v1286_v62 = vsel %vm812_vm2, %v1270_v38, 0.0  ;;  %v1288_v61 = vsel %vm812_vm2, %v1271_v17, 0.0 }
 0x2cf   : > { %v1772_v52 = vpop.eup %1771  ;;  %v1197_v11 = vadd.f32 %v1174_v49, %v1133_v26  ;;  %v1259_v18 = vsub.f32 %v1195_v37, %v1243_v54  ;;  %v1273_v19 = vsel %vm1225_vm11, %v1257_v25, 0.0  ;;  %v1287_v56 = vadd.f32 %v1286_v62, %v1285_v7  ;;  %v1138_v25 = vld [vmem:[#allocation2 + $0x68] sm:$0xff]  ;;  %v1248_v26 = vld [vmem:[#allocation4 + $0x58] sm:$0xff]  ;;  %v1139_v54 = vld [vmem:[#allocation2 + $0x70] sm:$0xff] }
 0x2d0   : > { %v1182_v33 = vmul.f32 0.6931472, %v1768_v4  ;;  %v1198_v29 = vadd.f32 %v1176_v46, %v1134_v47  ;;  %vm1231_vm1 = vcmp.ne.s32.totalorder %v2684_v9, 4294967295  ;;  %v1290_v48 = vsel %vm812_vm2, %v1272_v32, 0.0  ;;  %v1249_v7 = vld [vmem:[#allocation4 + $0x60] sm:$0xff] }
 0x2d1   : > { %v1199_v13 = vadd.f32 %v1178_v21, %v1135_v45  ;;  %v1260_v42 = vsub.f32 %v1196_v57, %v1244_v59  ;;  %v1274_v8 = vsel %vm1226_vm12, %v1258_v30, 0.0  ;;  %v1289_v39 = vadd.f32 %v1288_v61, %v1287_v56  ;;  %v1140_v59 = vld [vmem:[#allocation2 + $0x78] sm:$0xff] }
 0x2d2   : > { %v1774_v35 = vpop.eup %1773  ;;  %v1184_v43 = vmul.f32 0.6931472, %v1770_v0  ;;  %v1186_v44 = vmul.f32 0.6931472, %v1772_v52  ;;  %v1200_v23 = vadd.f32 %v1180_v60, %v1136_v53  ;;  %vm1232_vm3 = vcmp.ne.s32.totalorder %v2693_v20, 4294967295 }
 0x2d3   : > { %v1292_v12 = vsel %vm812_vm2, %v1273_v19, 0.0  ;;  %v1261_v24 = vsub.f32 %v1197_v11, %v1245_v10  ;;  %v1275_v41 = vsel %vm1227_vm13, %v1259_v18, 0.0  ;;  %v1291_v14 = vadd.f32 %v1290_v48, %v1289_v39  ;;  %v1250_v18 = vld [vmem:[#allocation4 + $0x68] sm:$0xff] }
 0x2d4   : > { %v1890_v31 = vmov 0.0   ;;  %v1201_v40 = vadd.f32 %v1182_v33, %v1137_v27  ;;  %vm1233_vm4 = vcmp.ne.s32.totalorder %v2700_v2, 4294967295  ;;  %v1294_v34 = vsel %vm812_vm2, %v1274_v8, 0.0  ;;  %v1218_v33 = vld [vmem:[%s2037_s28 + $0x68] sm:$0xff] }
 0x2d5   : > { %v1554_v49 = vsel %vm1221_vm7, 1.0, %v1890_v31  ;;  %v1555_v51 = vsel %vm1222_vm8, 1.0, %v1890_v31  ;;  %v1556_v37 = vsel %vm1223_vm9, 1.0, %v1890_v31  ;;  %v1188_v38 = vmul.f32 0.6931472, %v1774_v35  ;;  %v1219_v35 = vld [vmem:[%s2037_s28 + $0x70] sm:$0xff] }
 0x2d6   : > { %v1262_v17 = vsub.f32 %v1198_v29, %v1246_v50  ;;  %v1276_v22 = vsel %vm1228_vm14, %v1260_v42, 0.0  ;;  %v1293_v4 = vadd.f32 %v1292_v12, %v1291_v14  ;;  %v1263_v47 = vsub.f32 %v1199_v13, %v1247_v16  ;;  %v1251_v42 = vld [vmem:[#allocation4 + $0x70] sm:$0xff]  ;;  %v1252_v12 = vld [vmem:[#allocation4 + $0x78] sm:$0xff] }
 0x2d7   : > { %v1296_v46 = vsel %vm812_vm2, %v1275_v41, 0.0  ;;  %v1557_v28 = vsel %vm1224_vm10, 1.0, %v1890_v31  ;;  %v1357_v57 = vsel %vm812_vm2, %v1554_v49, 0.0  ;;  %v1277_v3 = vsel %vm1229_vm15, %v1261_v24, 0.0 }
 0x2d8   : > { %v1295_v45 = vadd.f32 %v1294_v34, %v1293_v4  ;;  %v1358_v21 = vsel %vm812_vm2, %v1555_v51, 0.0  ;;  %v1360_v30 = vsel %vm812_vm2, %v1556_v37, 0.0  ;;  %v1202_v32 = vadd.f32 %v1184_v43, %v1138_v25 }
 0x2d9   : > { %v1298_v0 = vsel %vm812_vm2, %v1276_v22, 0.0  ;;  %v1558_v15 = vsel %vm1225_vm11, 1.0, %v1890_v31  ;;  %v1359_v60 = vadd.f32 %v1358_v21, %v1357_v57  ;;  %v1264_v62 = vsub.f32 %v1200_v23, %v1248_v26 }
 0x2da   : > { %v1278_v61 = vsel %vm1230_vm0, %v1262_v17, 0.0  ;;  %v1297_v52 = vadd.f32 %v1296_v46, %v1295_v45  ;;  %v1362_v53 = vsel %vm812_vm2, %v1557_v28, 0.0  ;;  %v1203_v11 = vadd.f32 %v1186_v44, %v1139_v54 }
 0x2db   : > { %v1300_v19 = vsel %vm812_vm2, %v1277_v3, 0.0  ;;  %v1559_v56 = vsel %vm1226_vm12, 1.0, %v1890_v31  ;;  %v1361_v63 = vadd.f32 %v1360_v30, %v1359_v60  ;;  %v1265_v29 = vsub.f32 %v1201_v40, %v1249_v7 }
 0x2dc   : > { %v1279_v10 = vsel %vm1231_vm1, %v1263_v47, 0.0  ;;  %v1299_v48 = vadd.f32 %v1298_v0, %v1297_v52  ;;  %v1364_v27 = vsel %vm812_vm2, %v1558_v15, 0.0  ;;  %v1204_v13 = vadd.f32 %v1188_v38, %v1140_v59 }
 0x2dd   : > { %v1302_v8 = vsel %vm812_vm2, %v1278_v61, 0.0  ;;  %v1560_v39 = vsel %vm1227_vm13, 1.0, %v1890_v31  ;;  %v1363_v36 = vadd.f32 %v1362_v53, %v1361_v63  ;;  %v1266_v43 = vsub.f32 %v1202_v32, %v1250_v18 }
 0x2de   : > { %v1280_v44 = vsel %vm1232_vm3, %v1264_v62, 0.0  ;;  %v1301_v23 = vadd.f32 %v1300_v19, %v1299_v48  ;;  %v1366_v50 = vsel %vm812_vm2, %v1559_v56, 0.0  ;;  %vm1234_vm5 = vcmp.ne.s32.totalorder %v1218_v33, 4294967295 }
 0x2df   : > { %v1304_v16 = vsel %vm812_vm2, %v1279_v10, 0.0  ;;  %v1561_v24 = vsel %vm1228_vm14, 1.0, %v1890_v31  ;;  %v1365_v41 = vadd.f32 %v1364_v27, %v1363_v36  ;;  %v1267_v14 = vsub.f32 %v1203_v11, %v1251_v42 }
 0x2e0   : > { %v1281_v49 = vsel %vm1233_vm4, %v1265_v29, 0.0  ;;  %v1303_v40 = vadd.f32 %v1302_v8, %v1301_v23  ;;  %v1368_v34 = vsel %vm812_vm2, %v1560_v39, 0.0  ;;  %vm1235_vm6 = vcmp.ne.s32.totalorder %v1219_v35, 4294967295 }
 0x2e1   : > { %v1306_v51 = vsel %vm812_vm2, %v1280_v44, 0.0  ;;  %v1562_v37 = vsel %vm1229_vm15, 1.0, %v1890_v31  ;;  %v1367_v25 = vadd.f32 %v1366_v50, %v1365_v41  ;;  %v1268_v38 = vsub.f32 %v1204_v13, %v1252_v12 }
 0x2e2   : > { %v1282_v5 = vsel %vm1234_vm5, %v1266_v43, 0.0  ;;  %v1305_v17 = vadd.f32 %v1304_v16, %v1303_v40  ;;  %v1370_v22 = vsel %vm812_vm2, %v1561_v24, 0.0  ;;  %vm1236_vm7 = vcmp.ne.s32.totalorder %v1220_v55, 4294967295 }
 0x2e3   : > { %v1308_v4 = vsel %vm812_vm2, %v1281_v49, 0.0  ;;  %v1563_v26 = vsel %vm1230_vm0, 1.0, %v1890_v31  ;;  %v1369_v47 = vadd.f32 %v1368_v34, %v1367_v25  ;;  %v1283_v46 = vsel %vm1235_vm6, %v1267_v14, 0.0 }
 0x2e4   : > { %v1307_v28 = vadd.f32 %v1306_v51, %v1305_v17  ;;  %v1372_v58 = vsel %vm812_vm2, %v1562_v37, 0.0  ;;  %v1310_v57 = vsel %vm812_vm2, %v1282_v5, 0.0  ;;  %v1564_v54 = vsel %vm1231_vm1, 1.0, %v1890_v31 }
 0x2e5   : > { %v1371_v3 = vadd.f32 %v1370_v22, %v1369_v47  ;;  %v1284_v45 = vsel %vm1236_vm7, %v1268_v38, 0.0  ;;  %v1374_v30 = vsel %vm812_vm2, %v1563_v26, 0.0  ;;  %v1312_v6 = vsel %vm812_vm2, %v1283_v46, 0.0 }
 0x2e6   : > { %v1309_v21 = vadd.f32 %v1308_v4, %v1307_v28  ;;  %v1565_v32 = vsel %vm1232_vm3, 1.0, %v1890_v31  ;;  %v1376_v15 = vsel %vm812_vm2, %v1564_v54, 0.0  ;;  %v1314_v60 = vsel %vm812_vm2, %v1284_v45, 0.0 }
 0x2e7   : > { %v1373_v7 = vadd.f32 %v1372_v58, %v1371_v3  ;;  %v1566_v9 = vsel %vm1233_vm4, 1.0, %v1890_v31  ;;  %v1378_v61 = vsel %vm812_vm2, %v1565_v32, 0.0  ;;  %v1567_v52 = vsel %vm1234_vm5, 1.0, %v1890_v31 }
 0x2e8   : > { %v1311_v0 = vadd.f32 %v1310_v57, %v1309_v21  ;;  %v1380_v11 = vsel %vm812_vm2, %v1566_v9, 0.0  ;;  %v1568_v18 = vsel %vm1235_vm6, 1.0, %v1890_v31  ;;  %v1382_v56 = vsel %vm812_vm2, %v1567_v52, 0.0 }
 0x2e9   : > { %v1375_v59 = vadd.f32 %v1374_v30, %v1373_v7  ;;  %v1569_v2 = vsel %vm1236_vm7, 1.0, %v1890_v31  ;;  %v1384_v29 = vsel %vm812_vm2, %v1568_v18, 0.0  ;;  %vm1400_vm8 = vcmp.eq.s32.totalorder %v2449_v1, 1 }
 0x2ea   : > { %v1313_v62 = vadd.f32 %v1312_v6, %v1311_v0  ;;  %v1386_v33 = vsel %vm812_vm2, %v1569_v2, 0.0  ;;  %vm1397_vm2 = vcmp.eq.s32.totalorder %v2449_v1, 0 }
 0x2eb   : > { %v1377_v53 = vadd.f32 %v1376_v15, %v1375_v59 }
 0x2ec   : > { %v1315_v20 = vadd.f32 %v1314_v60, %v1313_v62 }
 0x2ed   : > { %v1379_v19 = vadd.f32 %v1378_v61, %v1377_v53 }
 0x2ee   : > { %1316 = vadd.xlane.f32.xlu0 %v1315_v20 }
 0x2ef   : > { %v1381_v63 = vadd.f32 %v1380_v11, %v1379_v19 }
 0x2f1   : > { %v1383_v10 = vadd.f32 %v1382_v56, %v1381_v63 }
 0x2f3   : > { %v1385_v48 = vadd.f32 %v1384_v29, %v1383_v10 }
 0x2f5   : > { %v1387_v27 = vadd.f32 %v1386_v33, %v1385_v48 }
 0x2f7   : > { %1388 = vadd.xlane.f32.xlu0 %v1387_v27 }
 0x361   : > { %v1317_v13 = vpop.xlane.xlu0 %1316 }
 0x362   : > { %v1318_v42 = vrot.slane %v1317_v13, 4 }
 0x364   : > { %v1319_v8 = vadd.f32 %v1318_v42, %v1317_v13 }
 0x366   : > { %v1320_v39 = vrot.slane %v1319_v8, 2 }
 0x368   : > { %v1321_v36 = vadd.f32 %v1320_v39, %v1319_v8 }
 0x36a   : > { %v1389_v35 = vpop.xlane.xlu0 %1388  ;;  %v1322_v43 = vrot.slane %v1321_v36, 1 }
 0x36b   : > { %v1390_v44 = vrot.slane %v1389_v35, 4 }
 0x36c   : > { %v1323_v23 = vadd.f32 %v1322_v43, %v1321_v36 }
 0x36d   : > { %v1391_v50 = vadd.f32 %v1390_v44, %v1389_v35 }
 0x36e   : > { %1580 = vpush %v1323_v23 }
 0x36f   : > { %v1392_v31 = vrot.slane %v1391_v50, 2 }
 0x371   : > { %v1393_v12 = vadd.f32 %v1392_v31, %v1391_v50 }
 0x373   : > { %v1394_v16 = vrot.slane %v1393_v12, 1 }
 0x375   : > { %v1395_v24 = vadd.f32 %v1394_v16, %v1393_v12 }
 0x377   : > { %1582 = vpush %v1395_v24 }
 0x39f   : > { %s1581_s20 = spop %1580 }
 0x3a0   : > { %v1398_v41 = vstv %s1581_s20 }
 0x3a1   : > { %v1399_v14 = vsel %vm1397_vm2, %v1398_v41, 0.0 }
 0x3a8   : > { %s1583_s28 = spop %1582 }
 0x3a9   : > { %v1401_v55 = vstv %s1583_s28 }
 0x3aa   : > { %v1402_v49 = vsel %vm1400_vm8, %v1401_v55, 0.0 }
 0x3ab   : > { %v1403_v40 = vadd.f32 %v1402_v49, %v1399_v14 }
 0x3ad   : > { %1404 = vst [vmem:[%s2042_s22] sm:$0x1] %v1403_v40 }
 0x3ae PF: > { %s1414_s12 = scalar_lea.hbm %s2857_s4, %s1873_s21  ;;  %s1416_s13 = sshll.u32 %s2042_s22, 4  ;;  %s1417_s13 = int_to_ptr.vmem [resolvable:$true] %s1416_s13 }
 0x3af   : > { %s1418_s14 = sshll.u32 %s1414_s12, 4  ;;  %s2988_s25 = sand.u32 1, %s1853_s16   ;;  %s1419_s14 = int_to_ptr.hbm [resolvable:$true] %s1418_s14 }
 0x3b0   : > { %s1406_s29 = scalar_lea.sflag [#allocation7], %s2988_s25  ;;  %s1789_s26 = sshra.s32 %s1419_s14, 4  ;;  %s1790_s26 = int_to_ptr.hbm [resolvable:$true] %s1789_s26 }
 0x3b1   : > { %s1791_s30 = scalar_lea.hbm %s1790_s26, 1  ;;  %s1795_s1 = scalar_lea.hbm %s2857_s4, 2 }
 0x3b2   : > { %p1792_p7 = scmp.ne.s32.totalorder %s1790_s26, %s1791_s30  ;;  %p1796_p11 = scmp.lt.s32.totalorder %s1790_s26, %s2857_s4 }
 0x3b3   : > { %p1797_p13 = scmp.lt.s32.totalorder %s1795_s1, %s1791_s30 }
 0x3b4   : > { %p1793_p8 = pnand %p1792_p7, %p1995_p10 }
 0x3b5   : > { %p1798_p0 = por %p1797_p13, %p1796_p11 }
 0x3b6   : > { %p1794_p9 = pneg %p1793_p8 }
 0x3b8   : > { %p1799_p1 = pnand %p1798_p0, %p1794_p9 }
 0x3ba   : > { %1802 = shalt.err (!%p1799_p1)
}
 0x3bb   : > { %1584 = dma.vmem_to_hbm [thread:$0]  (%p1995_p10), %s1417_s13, 16, %s1419_s14, %s1406_s29  }
 0x3bc PF: > { %p1590_p2 = scmp.ge.s32.totalorder %s1885_s24, 2  ;;  %s1430_s21 = sand.u32 1, %s1849_s15  }
 0x3bd   : > { %s1431_s22 = scalar_lea.sflag [#allocation7], %s1430_s21 }
 0x3be   : > { %p1587_p3 = pnand %p1590_p2, %p2002_p12 }
 0x3c0   : > { %p1588_p4 = pneg %p1587_p3 }
 0x3c2   : > { %1844 = dma.done.wait (%p1588_p4), %s1431_s22, 16  }
 0x3c3   : > { %1846 = vsyncadd (%p1588_p4), %s1431_s22, 4294967280  ;;  %s17_s24 = sadd.s32 1, %s1885_s24   ;;  %s2989_s20 = sld [smem:[#allocation9_spill]] }
 0x3c4   : > { %p14_p5 = scmp.ge.s32.totalorder %s17_s24, 10   ;;  %s2990_s21 = sld [smem:[#allocation10_spill]] }
 0x3c5   : > { %s2991_s22 = sld [smem:[#allocation11_spill]]  ;;  %s2993_s15 = smov %s1853_s16 }
 0x3c6   : > { %s2992_s23 = sld [smem:[#allocation12_spill]]  ;;  %s2994_s16 = smov %s1857_s17 }
 0x3c7   : > { %s2995_s17 = smov %s2000_s10  ;;  %s2996_s18 = smov %s1865_s19 }
 0x3c8   : > { %s2997_s19 = smov %s1989_s7  ;;  %16 = sbr.rel (!%p14_p5) target bundleno = 8 (0x8), region = 134 }
 0x3cd   :  { %1436 = vsyncpa [#allocation7], 1 }
 0x3ce   :  { %1438 = vsyncpa [#allocation7 + $0x1], 1 }

</bundles_post_ra>
